<compile_context>
chip_gen: v7x
topology: tpu7x:2x2x1
jax: 0.10.0
libtpu: 0.0.40
codegen_flags: <defaults>
</compile_context>

<pallas_src>
import jax
import jax.numpy as jnp
import numpy as np
from jax.experimental import pallas as pl
from jax.experimental.pallas import tpu as pltpu

# Small shapes consistent with the module (hidden_size = H).
B, S, H = 2, 128, 256          # batch, seq, hidden  -> T = B*S = 256 tokens
MAX_T_BLK = 1024               # cap tokens per block so large T still fits VMEM


def resblock_kernel(x_ref, w_ref, b_ref, o_ref):
    x = x_ref[...]                                                   # (T_BLK, H) bf16
    # Linear: x @ W + b, f32 accumulation on the MXU.
    y = jnp.dot(x, w_ref[...], preferred_element_type=jnp.float32)   # (T_BLK, H) f32
    y = y + b_ref[...]                                               # (1, H) f32 bias
    # SiLU in f32 (sigmoid -> EUP); residual add in the output dtype (bf16).
    s = (y * jax.nn.sigmoid(y)).astype(o_ref.dtype)
    o_ref[...] = x + s


def _num_tensorcores_per_chip():
    """2 on dual-TC chips (v7x); 1 on single-TC chips (v4/v5e/v6e)."""
    try:
        kind = jax.devices()[0].device_kind.lower()
    except Exception:
        return 1
    return 2 if "v7" in kind else 1


def _round_up(x, m):
    return ((x + m - 1) // m) * m


def _build_call(t_pad, t_blk, h, dtype, *, single_buffer_invariants):
    if single_buffer_invariants:
        # Grid-invariant operands: single-buffered (no point double-buffering).
        w_spec = pl.BlockSpec((h, h), lambda i: (0, 0), pipeline_mode=pl.Buffered(1))
        b_spec = pl.BlockSpec((1, h), lambda i: (0, 0), pipeline_mode=pl.Buffered(1))
    else:
        w_spec = pl.BlockSpec((h, h), lambda i: (0, 0))
        b_spec = pl.BlockSpec((1, h), lambda i: (0, 0))
    return pl.pallas_call(
        resblock_kernel,
        out_shape=jax.ShapeDtypeStruct((t_pad, h), dtype),
        grid_spec=pltpu.PrefetchScalarGridSpec(
            num_scalar_prefetch=0,
            grid=(t_pad // t_blk,),
            in_specs=[
                pl.BlockSpec((t_blk, h), lambda i: (i, 0)),   # token tile (streams)
                w_spec,                                        # weight (grid-invariant)
                b_spec,                                        # bias   (grid-invariant)
            ],
            out_specs=pl.BlockSpec((t_blk, h), lambda i: (i, 0)),
        ),
        compiler_params=pltpu.CompilerParams(
            dimension_semantics=("parallel",)),
        input_output_aliases={0: 0},   # output reuses x's HBM buffer
    )


def resblock_forward(x, w, b):
    """x: [B, S, H] bf16, w: [H, H] bf16 (pre-transposed torch weight.T),
    b: [H] f32  ->  [B, S, H] bf16  (== ResBlock.forward)."""
    bb, ss, hh = x.shape
    t = bb * ss
    x2 = x.reshape(t, hh)
    b2 = b.reshape(1, hh).astype(jnp.float32)

    # One block per TensorCore (1 on v5e/v6e, 2 on v7x), capped at MAX_T_BLK
    # tokens per block; pad any trailing partial tile instead of dropping it.
    n_tc = _num_tensorcores_per_chip()
    n_blocks = max(n_tc, pl.cdiv(t, MAX_T_BLK))
    n_blocks = pl.cdiv(n_blocks, n_tc) * n_tc
    t_blk = _round_up(pl.cdiv(t, n_blocks), 8)
    t_pad = t_blk * n_blocks
    if t_pad != t:
        x2 = jnp.pad(x2, ((0, t_pad - t), (0, 0)))

    try:
        out = _build_call(t_pad, t_blk, hh, x.dtype,
                          single_buffer_invariants=True)(x2, w, b2)
    except Exception:
        # Fallback for jax builds that reject pipeline_mode=pl.Buffered(1).
        out = _build_call(t_pad, t_blk, hh, x.dtype,
                          single_buffer_invariants=False)(x2, w, b2)
    return out[:t].reshape(bb, ss, hh)


def _reference(x, w, b):
    """Pure-JAX f32 reference of the same forward pass."""
    xf = x.astype(jnp.float32)
    y = jnp.einsum("bsh,hk->bsk", xf, w.astype(jnp.float32)) + b.astype(jnp.float32)
    return xf + y * jax.nn.sigmoid(y)


if __name__ == "__main__":
    key = jax.random.PRNGKey(0)
    k_x, k_w, k_b = jax.random.split(key, 3)

    # NOTE: the module zero-inits the weight; random weights are used here so the
    # matmul path is actually exercised (forward-pass semantics are identical).
    x = (jax.random.normal(k_x, (B, S, H), jnp.float32) * 0.5).astype(jnp.bfloat16)
    w = (jax.random.normal(k_w, (H, H), jnp.float32) * 0.05).astype(jnp.bfloat16)
    b = jax.random.normal(k_b, (H,), jnp.float32) * 0.05

    out = jax.block_until_ready(resblock_forward(x, w, b))

    ref = _reference(x, w, b)
    np.testing.assert_allclose(np.asarray(out, dtype=np.float32), np.asarray(ref),
                               atol=3e-2, rtol=3e-2)

    assert out.shape == (B, S, H) and out.dtype == jnp.bfloat16
    print("KERNEL_OK")
</pallas_src>

<mosaic_0001>
module attributes {stable_mosaic.version = 11 : i64} {
  func.func @resblock_kernel(%arg0: i32, %arg1: memref<256x256xbf16, #tpu.memory_space<vmem>>, %arg2: memref<256x256xbf16, #tpu.memory_space<vmem>>, %arg3: memref<1x256xf32, #tpu.memory_space<vmem>>, %arg4: memref<256x256xbf16, #tpu.memory_space<vmem>>) attributes {dimension_semantics = [#tpu.dimension_semantics<parallel>], iteration_bounds = array<i64: 1>, scalar_prefetch = 0 : i64, scratch_operands = 0 : i64, tpu.core_type = #tpu.core_type<tc>, window_params = [{transform_indices = @transform_0, window_bounds = array<i64: 256, 256>}, {pipeline_mode = #tpu.pipeline_mode<synchronous>, transform_indices = @transform_1, window_bounds = array<i64: 256, 256>}, {pipeline_mode = #tpu.pipeline_mode<synchronous>, transform_indices = @transform_2, window_bounds = array<i64: 1, 256>}, {transform_indices = @transform_3, window_bounds = array<i64: 256, 256>}]} {
    %c0 = arith.constant 0 : index
    %c0_0 = arith.constant 0 : index
    %0 = vector.load %arg1[%c0, %c0_0] : memref<256x256xbf16, #tpu.memory_space<vmem>>, vector<256x256xbf16>
    %c0_1 = arith.constant 0 : index
    %c0_2 = arith.constant 0 : index
    %1 = vector.load %arg2[%c0_1, %c0_2] : memref<256x256xbf16, #tpu.memory_space<vmem>>, vector<256x256xbf16>
    %cst = arith.constant dense<0.000000e+00> : vector<256x256xf32>
    %2 = tpu.matmul %0, %1, %cst {dimension_numbers = #tpu.dot_dimension_numbers<[1], [0], [0], [1], [0, 0, 1, 1], [], []>} : vector<256x256xbf16>, vector<256x256xbf16>, vector<256x256xf32> -> vector<256x256xf32>
    %c0_3 = arith.constant 0 : index
    %c0_4 = arith.constant 0 : index
    %3 = vector.load %arg3[%c0_3, %c0_4] : memref<1x256xf32, #tpu.memory_space<vmem>>, vector<1x256xf32>
    %4 = vector.broadcast %3 : vector<1x256xf32> to vector<256x256xf32>
    %5 = arith.addf %2, %4 : vector<256x256xf32>
    %6 = arith.negf %5 : vector<256x256xf32>
    %7 = math.exp %6 : vector<256x256xf32>
    %cst_5 = arith.constant 1.000000e+00 : f32
    %8 = vector.broadcast %cst_5 : f32 to vector<256x256xf32>
    %9 = arith.addf %8, %7 : vector<256x256xf32>
    %10 = arith.divf %8, %9 : vector<256x256xf32>
    %11 = arith.mulf %5, %10 : vector<256x256xf32>
    %12 = arith.truncf %11 : vector<256x256xf32> to vector<256x256xbf16>
    %13 = arith.addf %0, %12 : vector<256x256xbf16>
    %c0_6 = arith.constant 0 : index
    %c0_7 = arith.constant 0 : index
    %14 = vector.load %arg4[%c0_6, %c0_7] : memref<256x256xbf16, #tpu.memory_space<vmem>>, vector<256x256xbf16>
    tpu.vector_store %arg4[%c0_6, %c0_7], %13 {strides = array<i32>} : memref<256x256xbf16, #tpu.memory_space<vmem>>, vector<256x256xbf16>,
    return
  }
  func.func @transform_0(%arg0: i32) -> (i32, i32) {
    %c0_i32 = arith.constant 0 : i32
    %c0_i32_0 = arith.constant 0 : i32
    return %arg0, %c0_i32 : i32, i32
  }
  func.func @transform_1(%arg0: i32) -> (i32, i32) {
    %c0_i32 = arith.constant 0 : i32
    %c0_i32_0 = arith.constant 0 : i32
    %c0_i32_1 = arith.constant 0 : i32
    return %c0_i32, %c0_i32_0 : i32, i32
  }
  func.func @transform_2(%arg0: i32) -> (i32, i32) {
    %c0_i32 = arith.constant 0 : i32
    %c0_i32_0 = arith.constant 0 : i32
    %c0_i32_1 = arith.constant 0 : i32
    return %c0_i32, %c0_i32_0 : i32, i32
  }
  func.func @transform_3(%arg0: i32) -> (i32, i32) {
    %c0_i32 = arith.constant 0 : i32
    %c0_i32_0 = arith.constant 0 : i32
    return %arg0, %c0_i32 : i32, i32
  }
}

module attributes {stable_mosaic.version = 11 : i64} {
  func.func @resblock_kernel(%arg0: i32, %arg1: memref<256x256xbf16, #tpu.memory_space<vmem>>, %arg2: memref<256x256xbf16, #tpu.memory_space<vmem>>, %arg3: memref<1x256xf32, #tpu.memory_space<vmem>>, %arg4: memref<256x256xbf16, #tpu.memory_space<vmem>>) attributes {dimension_semantics = [#tpu.dimension_semantics<parallel>], iteration_bounds = array<i64: 1>, scalar_prefetch = 0 : i64, scratch_operands = 0 : i64, tpu.core_type = #tpu.core_type<tc>, window_params = [{transform_indices = @transform_0, window_bounds = array<i64: 256, 256>}, {pipeline_mode = #tpu.pipeline_mode<synchronous>, transform_indices = @transform_1, window_bounds = array<i64: 256, 256>}, {pipeline_mode = #tpu.pipeline_mode<synchronous>, transform_indices = @transform_2, window_bounds = array<i64: 1, 256>}, {transform_indices = @transform_3, window_bounds = array<i64: 256, 256>}]} {
    %c0 = arith.constant 0 : index
    %c0_0 = arith.constant 0 : index
    %0 = vector.load %arg1[%c0, %c0_0] : memref<256x256xbf16, #tpu.memory_space<vmem>>, vector<256x256xbf16>
    %c0_1 = arith.constant 0 : index
    %c0_2 = arith.constant 0 : index
    %1 = vector.load %arg2[%c0_1, %c0_2] : memref<256x256xbf16, #tpu.memory_space<vmem>>, vector<256x256xbf16>
    %cst = arith.constant dense<0.000000e+00> : vector<256x256xf32>
    %2 = tpu.matmul %0, %1, %cst {dimension_numbers = #tpu.dot_dimension_numbers<[1], [0], [0], [1], [0, 0, 1, 1], [], []>} : vector<256x256xbf16>, vector<256x256xbf16>, vector<256x256xf32> -> vector<256x256xf32>
    %c0_3 = arith.constant 0 : index
    %c0_4 = arith.constant 0 : index
    %3 = vector.load %arg3[%c0_3, %c0_4] : memref<1x256xf32, #tpu.memory_space<vmem>>, vector<1x256xf32>
    %4 = vector.broadcast %3 : vector<1x256xf32> to vector<256x256xf32>
    %5 = arith.addf %2, %4 : vector<256x256xf32>
    %6 = arith.negf %5 : vector<256x256xf32>
    %7 = math.exp %6 : vector<256x256xf32>
    %cst_5 = arith.constant 1.000000e+00 : f32
    %8 = vector.broadcast %cst_5 : f32 to vector<256x256xf32>
    %9 = arith.addf %8, %7 : vector<256x256xf32>
    %10 = arith.divf %8, %9 : vector<256x256xf32>
    %11 = arith.mulf %5, %10 : vector<256x256xf32>
    %12 = arith.truncf %11 : vector<256x256xf32> to vector<256x256xbf16>
    %13 = arith.addf %0, %12 : vector<256x256xbf16>
    %c0_6 = arith.constant 0 : index
    %c0_7 = arith.constant 0 : index
    %14 = vector.load %arg4[%c0_6, %c0_7] : memref<256x256xbf16, #tpu.memory_space<vmem>>, vector<256x256xbf16>
    tpu.vector_store %arg4[%c0_6, %c0_7], %13 {strides = array<i32>} : memref<256x256xbf16, #tpu.memory_space<vmem>>, vector<256x256xbf16>,
    return
  }
  func.func @transform_0(%arg0: i32) -> (i32, i32) {
    %c0_i32 = arith.constant 0 : i32
    %c0_i32_0 = arith.constant 0 : i32
    return %arg0, %c0_i32 : i32, i32
  }
  func.func @transform_1(%arg0: i32) -> (i32, i32) {
    %c0_i32 = arith.constant 0 : i32
    %c0_i32_0 = arith.constant 0 : i32
    %c0_i32_1 = arith.constant 0 : i32
    return %c0_i32, %c0_i32_0 : i32, i32
  }
  func.func @transform_2(%arg0: i32) -> (i32, i32) {
    %c0_i32 = arith.constant 0 : i32
    %c0_i32_0 = arith.constant 0 : i32
    %c0_i32_1 = arith.constant 0 : i32
    return %c0_i32, %c0_i32_0 : i32, i32
  }
  func.func @transform_3(%arg0: i32) -> (i32, i32) {
    %c0_i32 = arith.constant 0 : i32
    %c0_i32_0 = arith.constant 0 : i32
    return %arg0, %c0_i32 : i32, i32
  }
}

</mosaic_0001>

<bundles_post_ra>
// kernel: tpu_custom_call.1
= control target key start
LH: loop header
LB: loop body
LE: loop exit
PB: predicated region body
PF: predicated region fallthrough
CT: control target
= control target key end

     0   :  { %8 = vsyncpa [#allocation3], 0  ;;  %s2643_s0 = inlined_call_operand.hbm [shape: bf16[256,256], index: 0, kind: input, shape index: {}, may-alias: {0,3}]   ;;  %s2644_s1 = inlined_call_operand.vmem [shape: bf16[256,256], index: 1, kind: input, shape index: {}]   ;;  %s2645_s2 = inlined_call_operand.vmem [shape: f32[1,256], index: 2, kind: input, shape index: {}]   ;;  %s2646_s3 = inlined_call_operand.hbm [shape: bf16[256,256], index: 3, kind: output, shape index: {}, may-alias: {0,3}]  }
   0x1   :  { %9 = vsyncpa [#allocation4], 0  ;;  %s1968_s12 = smov [#allocation2]   ;;  %s1920_s16 = scalar_lea.hbm %s2643_s0, 4096 }
   0x2   :  { %s15_s13 = sshll.u32 %s1968_s12, 4  ;;  %p1921_p0 = scmp.ne.s32.totalorder %s2643_s0, %s1920_s16  ;;  %s16_s13 = int_to_ptr.vmem [resolvable:$true] %s15_s13 }
   0x3   :  { %p1924_p1 = scmp.lt.u32.totalorder %s1920_s16, %s2643_s0 }
   0x5   :  { %p1926_p2 = pnand %p1924_p1, %p1921_p0 }
   0x7   :  { %1929 = shalt.err (!%p1926_p2)
}
   0x8   :  { %s1930_s21 = scalar_lea.vmem %s16_s13, 4096  ;;  %p1935_p4 = scmp.lt.s32.totalorder %s16_s13, %s16_s13 }
   0x9   :  { %p1931_p3 = scmp.ne.s32.totalorder %s16_s13, %s1930_s21  ;;  %p1936_p5 = scmp.lt.s32.totalorder %s1930_s21, %s1930_s21 }
   0xb   :  { %p1937_p6 = por %p1936_p5, %p1935_p4 }
   0xd   :  { %p1938_p7 = pnand %p1937_p6, %p1931_p3 }
   0xf   :  { %1941 = shalt.err (!%p1938_p7)
}
  0x10   :  { %s1969_s22 = smov 128   ;;  %s1970_s23 = smov 8  }
  0x11   :  { %21 = dma.hbm_to_vmem [thread:$0]  %s2643_s0, 4096, %s16_s13, [#allocation3], %s1969_s22, %s1969_s22, %s1970_s23  }
  0x12   :  { %1964 = dma.done.wait [#allocation3], 4096  }
  0x13   :  { %1965 = vsyncadd [#allocation3], 4294963200  ;;  %v1567_v0 = vld [vmem:[%s2644_s1 + $0x4] ss:$8 sps:$4 sm:$0xff]   ;;  %v1569_v1 = vld [vmem:[%s2644_s1] ss:$8 sps:$4 sm:$0xff]  }
  0x14   :  { %425 = vmatprep.subr.bf16.mxu0 %v1567_v0  ;;  %1531 = vmatprep.subr.bf16.mxu1 %v1567_v0  ;;  %v1570_v2 = vld [vmem:[%s2644_s1 + $0x14] ss:$8 sps:$4 sm:$0xff]   ;;  %v1572_v3 = vld [vmem:[%s2644_s1 + $0x10] ss:$8 sps:$4 sm:$0xff]   ;;  %v1573_v4 = vld [vmem:[%s2644_s1 + $0x24] ss:$8 sps:$4 sm:$0xff]  }
  0x15   :  { %426 = vmatpush1.bf16.msra.mxu0 %v1569_v1  ;;  %1547 = vmatpush1.bf16.msra.mxu1 %v1569_v1  ;;  %v1575_v5 = vld [vmem:[%s2644_s1 + $0x20] ss:$8 sps:$4 sm:$0xff]   ;;  %v1576_v6 = vld [vmem:[%s2644_s1 + $0x34] ss:$8 sps:$4 sm:$0xff]   ;;  %v1578_v7 = vld [vmem:[%s2644_s1 + $0x30] ss:$8 sps:$4 sm:$0xff]  }
  0x16   :  { %427 = vmatprep.subr.bf16.mxu0 %v1570_v2  ;;  %1532 = vmatprep.subr.bf16.mxu1 %v1570_v2  ;;  %v1579_v8 = vld [vmem:[%s2644_s1 + $0x44] ss:$8 sps:$4 sm:$0xff]   ;;  %v1581_v9 = vld [vmem:[%s2644_s1 + $0x40] ss:$8 sps:$4 sm:$0xff]   ;;  %v1582_v10 = vld [vmem:[%s2644_s1 + $0x54] ss:$8 sps:$4 sm:$0xff]  }
  0x17   :  { %v1584_v11 = vld [vmem:[%s2644_s1 + $0x50] ss:$8 sps:$4 sm:$0xff]   ;;  %v1585_v12 = vld [vmem:[%s2644_s1 + $0x64] ss:$8 sps:$4 sm:$0xff]   ;;  %v1587_v18 = vld [vmem:[%s2644_s1 + $0x60] ss:$8 sps:$4 sm:$0xff]  }
  0x18   :  { %v2046_v13 = vld [vmem:[#allocation2] sm:$0xff]  ;;  %v2048_v14 = vld [vmem:[#allocation2 + $0x8] sm:$0xff]  ;;  %v1588_v20 = vld [vmem:[%s2644_s1 + $0x74] ss:$8 sps:$4 sm:$0xff]  }
  0x19   :  { %428 = vmatpush1.bf16.msra.mxu0 %v1572_v3  ;;  %1548 = vmatpush1.bf16.msra.mxu1 %v1572_v3  ;;  %v1340_v15 = vcombine.high %v2046_v13, %v2048_v14  ;;  %v2052_v16 = vld [vmem:[#allocation2 + $0x80] sm:$0xff]  ;;  %v2054_v17 = vld [vmem:[#allocation2 + $0x88] sm:$0xff]  ;;  %v1590_v21 = vld [vmem:[%s2644_s1 + $0x70] ss:$8 sps:$4 sm:$0xff]   ;;  %v1339_v42 = vcombine.low %v2046_v13, %v2048_v14 }
  0x1a   :  { %429 = vmatprep.subr.bf16.mxu0 %v1573_v4  ;;  %1533 = vmatprep.subr.bf16.mxu1 %v1573_v4  ;;  %v1356_v19 = vcombine.high %v2052_v16, %v2054_v17  ;;  %v1591_v22 = vld [vmem:[%s2644_s1 + $0x84] ss:$8 sps:$4 sm:$0xff]   ;;  %v1593_v23 = vld [vmem:[%s2644_s1 + $0x80] ss:$8 sps:$4 sm:$0xff]   ;;  %v1594_v24 = vld [vmem:[%s2644_s1 + $0x94] ss:$8 sps:$4 sm:$0xff]   ;;  %v1355_v43 = vcombine.low %v2052_v16, %v2054_v17 }
  0x1b   :  { %457 = vmatprep.mubr.bf16.mxu0 %v1340_v15  ;;  %v1596_v25 = vld [vmem:[%s2644_s1 + $0x90] ss:$8 sps:$4 sm:$0xff]   ;;  %v1597_v26 = vld [vmem:[%s2644_s1 + $0xa4] ss:$8 sps:$4 sm:$0xff]   ;;  %v1599_v27 = vld [vmem:[%s2644_s1 + $0xa0] ss:$8 sps:$4 sm:$0xff]  }
  0x1c   :  { %537 = vmatprep.mubr.bf16.mxu1 %v1356_v19  ;;  %v1600_v28 = vld [vmem:[%s2644_s1 + $0xb4] ss:$8 sps:$4 sm:$0xff]   ;;  %v1602_v29 = vld [vmem:[%s2644_s1 + $0xb0] ss:$8 sps:$4 sm:$0xff]   ;;  %v1603_v30 = vld [vmem:[%s2644_s1 + $0xc4] ss:$8 sps:$4 sm:$0xff]  }
  0x1d   :  { %430 = vmatpush1.bf16.msra.mxu0 %v1575_v5  ;;  %1549 = vmatpush1.bf16.msra.mxu1 %v1575_v5  ;;  %v1605_v31 = vld [vmem:[%s2644_s1 + $0xc0] ss:$8 sps:$4 sm:$0xff]   ;;  %v1606_v32 = vld [vmem:[%s2644_s1 + $0xd4] ss:$8 sps:$4 sm:$0xff]   ;;  %v1608_v33 = vld [vmem:[%s2644_s1 + $0xd0] ss:$8 sps:$4 sm:$0xff]  }
  0x1e   :  { %431 = vmatprep.subr.bf16.mxu0 %v1576_v6  ;;  %1534 = vmatprep.subr.bf16.mxu1 %v1576_v6  ;;  %v1609_v34 = vld [vmem:[%s2644_s1 + $0xe4] ss:$8 sps:$4 sm:$0xff]   ;;  %v1611_v35 = vld [vmem:[%s2644_s1 + $0xe0] ss:$8 sps:$4 sm:$0xff]   ;;  %v1612_v36 = vld [vmem:[%s2644_s1 + $0xf4] ss:$8 sps:$4 sm:$0xff]  }
  0x1f   :  { %v1614_v37 = vld [vmem:[%s2644_s1 + $0xf0] ss:$8 sps:$4 sm:$0xff]   ;;  %v2131_v46 = vld [vmem:[#allocation2 + $0x20] sm:$0xff]  ;;  %v2133_v47 = vld [vmem:[#allocation2 + $0x28] sm:$0xff] }
  0x20   :  { %v2115_v38 = vld [vmem:[#allocation2 + $0x10] sm:$0xff]  ;;  %v2117_v39 = vld [vmem:[#allocation2 + $0x18] sm:$0xff]  ;;  %2653 = vst [vmem:[#allocation8_spill] sm:$0xff] %v2133_v47  ;;  %v2135_v48 = vld [vmem:[#allocation2 + $0xa0] sm:$0xff]  ;;  %v1344_v52 = vcombine.high %v2131_v46, %v2133_v47  ;;  %v1343_v58 = vcombine.low %v2131_v46, %v2133_v47 }
  0x21   :  { %432 = vmatpush1.bf16.msra.mxu0 %v1578_v7  ;;  %1550 = vmatpush1.bf16.msra.mxu1 %v1578_v7  ;;  %v2119_v40 = vld [vmem:[#allocation2 + $0x90] sm:$0xff]  ;;  %v2121_v41 = vld [vmem:[#allocation2 + $0x98] sm:$0xff]  ;;  %v1342_v44 = vcombine.high %v2115_v38, %v2117_v39  ;;  %2654 = vst [vmem:[#allocation9_spill] sm:$0xff] %v2135_v48  ;;  %v2137_v49 = vld [vmem:[#allocation2 + $0xa8] sm:$0xff]  ;;  %v1341_v50 = vcombine.low %v2115_v38, %v2117_v39 }
  0x22   :  { %433 = vmatprep.subr.bf16.mxu0 %v1579_v8  ;;  %1535 = vmatprep.subr.bf16.mxu1 %v1579_v8  ;;  %v1358_v45 = vcombine.high %v2119_v40, %v2121_v41  ;;  %2655 = vst [vmem:[#allocation10_spill] sm:$0xff] %v2137_v49  ;;  %v1357_v51 = vcombine.low %v2119_v40, %v2121_v41  ;;  %v2147_v54 = vld [vmem:[#allocation2 + $0x30] sm:$0xff]  ;;  %v2149_v55 = vld [vmem:[#allocation2 + $0x38] sm:$0xff]  ;;  %v37_v62 = vld [vmem:[#allocation2 + $0x40] sm:$0xff] }
  0x23   :  { %v1360_v53 = vcombine.high %v2135_v48, %v2137_v49  ;;  %2656 = vst [vmem:[#allocation11_spill] sm:$0xff] %v2147_v54  ;;  %2657 = vst [vmem:[#allocation12_spill] sm:$0xff] %v2149_v55  ;;  %v2151_v56 = vld [vmem:[#allocation2 + $0xb0] sm:$0xff]  ;;  %v52_v57 = vld [vmem:[#allocation2 + $0xb8] sm:$0xff]  ;;  %v1359_v59 = vcombine.low %v2135_v48, %v2137_v49  ;;  %v1346_v60 = vcombine.high %v2147_v54, %v2149_v55 }
  0x24   :  { %2658 = vst [vmem:[#allocation13_spill] sm:$0xff] %v2151_v56  ;;  %v1362_v61 = vcombine.high %v2151_v56, %v52_v57  ;;  %v38_v63 = vld [vmem:[#allocation2 + $0x48] sm:$0xff]  ;;  %v53_v0 = vld [vmem:[#allocation2 + $0xc0] sm:$0xff]  ;;  %v1345_v2 = vcombine.low %v2147_v54, %v2149_v55  ;;  %v1361_v3 = vcombine.low %v2151_v56, %v52_v57  ;;  %v39_v6 = vld [vmem:[#allocation2 + $0x50] sm:$0xff] }
  0x25   :  { %434 = vmatpush1.bf16.msra.mxu0 %v1581_v9  ;;  %1551 = vmatpush1.bf16.msra.mxu1 %v1581_v9  ;;  %v54_v1 = vld [vmem:[#allocation2 + $0xc8] sm:$0xff]  ;;  %v1348_v4 = vcombine.high %v37_v62, %v38_v63  ;;  %v40_v7 = vld [vmem:[#allocation2 + $0x58] sm:$0xff]  ;;  %v55_v8 = vld [vmem:[#allocation2 + $0xd0] sm:$0xff] }
  0x26   :  { %435 = vmatprep.subr.bf16.mxu0 %v1582_v10  ;;  %1536 = vmatprep.subr.bf16.mxu1 %v1582_v10  ;;  %v1364_v5 = vcombine.high %v53_v0, %v54_v1  ;;  %v56_v9 = vld [vmem:[#allocation2 + $0xd8] sm:$0xff]  ;;  %v1347_v10 = vcombine.low %v37_v62, %v38_v63  ;;  %v42_v19 = vld [vmem:[#allocation2 + $0x68] sm:$0xff] }
  0x27   :  { %v1366_v15 = vcombine.high %v55_v8, %v56_v9 }
  0x29   :  { %436 = vmatpush1.bf16.msra.mxu0 %v1584_v11  ;;  %1552 = vmatpush1.bf16.msra.mxu1 %v1584_v11  ;;  %v1363_v11 = vcombine.low %v53_v0, %v54_v1 }
  0x2a   :  { %437 = vmatprep.subr.bf16.mxu0 %v1585_v12  ;;  %1537 = vmatprep.subr.bf16.mxu1 %v1585_v12  ;;  %v1350_v12 = vcombine.high %v39_v6, %v40_v7 }
  0x2d   :  { %438 = vmatpush1.bf16.msra.mxu0 %v1587_v18  ;;  %1553 = vmatpush1.bf16.msra.mxu1 %v1587_v18  ;;  %v41_v18 = vld [vmem:[#allocation2 + $0x60] sm:$0xff] }
  0x2e   :  { %439 = vmatprep.subr.bf16.mxu0 %v1588_v20  ;;  %1538 = vmatprep.subr.bf16.mxu1 %v1588_v20  ;;  %v57_v20 = vld [vmem:[#allocation2 + $0xe0] sm:$0xff] }
  0x31   :  { %440 = vmatpush1.bf16.msra.mxu0 %v1590_v21  ;;  %1554 = vmatpush1.bf16.msra.mxu1 %v1590_v21  ;;  %v58_v21 = vld [vmem:[#allocation2 + $0xe8] sm:$0xff] }
  0x32   :  { %441 = vmatprep.subr.bf16.mxu0 %v1591_v22  ;;  %1539 = vmatprep.subr.bf16.mxu1 %v1591_v22  ;;  %v1349_v22 = vcombine.low %v39_v6, %v40_v7 }
  0x35   :  { %442 = vmatpush1.bf16.msra.mxu0 %v1593_v23  ;;  %1555 = vmatpush1.bf16.msra.mxu1 %v1593_v23  ;;  %v1365_v23 = vcombine.low %v55_v8, %v56_v9 }
  0x36   :  { %443 = vmatprep.subr.bf16.mxu0 %v1594_v24  ;;  %1540 = vmatprep.subr.bf16.mxu1 %v1594_v24  ;;  %v1352_v24 = vcombine.high %v41_v18, %v42_v19 }
  0x39   :  { %444 = vmatpush1.bf16.msra.mxu0 %v1596_v25  ;;  %1556 = vmatpush1.bf16.msra.mxu1 %v1596_v25  ;;  %v1368_v25 = vcombine.high %v57_v20, %v58_v21 }
  0x3a   :  { %445 = vmatprep.subr.bf16.mxu0 %v1597_v26  ;;  %1541 = vmatprep.subr.bf16.mxu1 %v1597_v26  ;;  %v43_v26 = vld [vmem:[#allocation2 + $0x70] sm:$0xff] }
  0x3d   :  { %446 = vmatpush1.bf16.msra.mxu0 %v1599_v27  ;;  %1557 = vmatpush1.bf16.msra.mxu1 %v1599_v27  ;;  %v44_v27 = vld [vmem:[#allocation2 + $0x78] sm:$0xff] }
  0x3e   :  { %447 = vmatprep.subr.bf16.mxu0 %v1600_v28  ;;  %1542 = vmatprep.subr.bf16.mxu1 %v1600_v28  ;;  %v59_v28 = vld [vmem:[#allocation2 + $0xf0] sm:$0xff] }
  0x41   :  { %448 = vmatpush1.bf16.msra.mxu0 %v1602_v29  ;;  %1558 = vmatpush1.bf16.msra.mxu1 %v1602_v29  ;;  %v60_v29 = vld [vmem:[#allocation2 + $0xf8] sm:$0xff] }
  0x42   :  { %449 = vmatprep.subr.bf16.mxu0 %v1603_v30  ;;  %1543 = vmatprep.subr.bf16.mxu1 %v1603_v30  ;;  %v1351_v30 = vcombine.low %v41_v18, %v42_v19 }
  0x45   :  { %450 = vmatpush1.bf16.msra.mxu0 %v1605_v31  ;;  %1559 = vmatpush1.bf16.msra.mxu1 %v1605_v31  ;;  %v1367_v31 = vcombine.low %v57_v20, %v58_v21 }
  0x46   :  { %451 = vmatprep.subr.bf16.mxu0 %v1606_v32  ;;  %1544 = vmatprep.subr.bf16.mxu1 %v1606_v32  ;;  %v1354_v32 = vcombine.high %v43_v26, %v44_v27 }
  0x49   :  { %452 = vmatpush1.bf16.msra.mxu0 %v1608_v33  ;;  %1560 = vmatpush1.bf16.msra.mxu1 %v1608_v33  ;;  %v1370_v33 = vcombine.high %v59_v28, %v60_v29 }
  0x4a   :  { %453 = vmatprep.subr.bf16.mxu0 %v1609_v34  ;;  %1545 = vmatprep.subr.bf16.mxu1 %v1609_v34  ;;  %v1353_v34 = vcombine.low %v43_v26, %v44_v27 }
  0x4d   :  { %454 = vmatpush1.bf16.msra.mxu0 %v1611_v35  ;;  %1561 = vmatpush1.bf16.msra.mxu1 %v1611_v35  ;;  %v1369_v35 = vcombine.low %v59_v28, %v60_v29 }
  0x4e   :  { %455 = vmatprep.subr.bf16.mxu0 %v1612_v36  ;;  %1546 = vmatprep.subr.bf16.mxu1 %v1612_v36  ;;  %v95_v36 = vlaneseq }
  0x51   :  { %456 = vmatpush1.bf16.msra.mxu0 %v1614_v37  ;;  %1562 = vmatpush1.bf16.msra.mxu1 %v1614_v37  ;;  %v96_v37 = vshrl.u32 %v95_v36, 7 }
  0x54   :  { %458 = vmatmul.mubr.bf16.vlgmr.msra.gmra.mrb[0].mxu0 %v1339_v42  ;;  %538 = vmatmul.mubr.bf16.vlgmr.msra.gmra.mrb[0].mxu1 %v1355_v43  ;;  %v97_v42 = vsub.s32 0, %v96_v37  ;;  %v93_v43 = vld [vmem:[%s2645_s2] sm:$0x3]  ;;  %s1971_s2 = smov [#allocation5]  }
  0x55   :  { %467 = vmatprep.mubr.bf16.mxu0 %v1342_v44  ;;  %547 = vmatprep.mubr.bf16.mxu1 %v1358_v45  ;;  %v101_v44 = vsub.s32 1, %v96_v37  ;;  %s1327_s11 = sshll.u32 %s1971_s2, 4  ;;  %s1328_s11 = int_to_ptr.vmem [resolvable:$true] %s1327_s11 }
  0x56   :  { %v2166_v45 = vrot.slane %v93_v43, %v97_v42  ;;  %s1942_s12 = scalar_lea.vmem %s1328_s11, 4096  ;;  %p1947_p9 = scmp.lt.s32.totalorder %s1328_s11, %s1328_s11 }
  0x57   :  { %p1943_p8 = scmp.ne.s32.totalorder %s1328_s11, %s1942_s12  ;;  %p1948_p10 = scmp.lt.s32.totalorder %s1942_s12, %s1942_s12 }
  0x59   :  { %p1949_p11 = por %p1948_p10, %p1947_p9 }
  0x5b   :  { %p1950_p12 = pnand %p1949_p11, %p1943_p8 }
  0x5c   :  { %468 = vmatmul.mubr.bf16.gmra.mrb[4].mxu0 %v1341_v50  ;;  %548 = vmatmul.mubr.bf16.gmra.mrb[4].mxu1 %v1357_v51  ;;  %v2168_v50 = vrot.slane %v93_v43, %v101_v44 }
  0x5d   :  { %477 = vmatprep.mubr.bf16.mxu0 %v1344_v52  ;;  %557 = vmatprep.mubr.bf16.mxu1 %v1360_v53 }
  0x64   :  { %478 = vmatmul.mubr.bf16.gmra.mrb[8].mxu0 %v1343_v58  ;;  %558 = vmatmul.mubr.bf16.gmra.mrb[8].mxu1 %v1359_v59 }
  0x65   :  { %487 = vmatprep.mubr.bf16.mxu0 %v1346_v60  ;;  %567 = vmatprep.mubr.bf16.mxu1 %v1362_v61 }
  0x6c   :  { %488 = vmatmul.mubr.bf16.gmra.mrb[12].mxu0 %v1345_v2  ;;  %568 = vmatmul.mubr.bf16.gmra.mrb[12].mxu1 %v1361_v3 }
  0x6d   :  { %497 = vmatprep.mubr.bf16.mxu0 %v1348_v4  ;;  %577 = vmatprep.mubr.bf16.mxu1 %v1364_v5 }
  0x74   :  { %498 = vmatmul.mubr.bf16.gmra.mrb[16].mxu0 %v1347_v10  ;;  %578 = vmatmul.mubr.bf16.gmra.mrb[16].mxu1 %v1363_v11 }
  0x75   :  { %507 = vmatprep.mubr.bf16.mxu0 %v1350_v12  ;;  %587 = vmatprep.mubr.bf16.mxu1 %v1366_v15 }
  0x7c   :  { %508 = vmatmul.mubr.bf16.gmra.mrb[20].mxu0 %v1349_v22  ;;  %588 = vmatmul.mubr.bf16.gmra.mrb[20].mxu1 %v1365_v23 }
  0x7d   :  { %517 = vmatprep.mubr.bf16.mxu0 %v1352_v24  ;;  %597 = vmatprep.mubr.bf16.mxu1 %v1368_v25 }
  0x84   :  { %518 = vmatmul.mubr.bf16.gmra.mrb[24].mxu0 %v1351_v30  ;;  %598 = vmatmul.mubr.bf16.gmra.mrb[24].mxu1 %v1367_v31 }
  0x85   :  { %527 = vmatprep.mubr.bf16.mxu0 %v1354_v32  ;;  %607 = vmatprep.mubr.bf16.mxu1 %v1370_v33 }
  0x8c   :  { %528 = vmatmul.mubr.bf16.gmra.mrb[28].mxu0 %v1353_v34  ;;  %608 = vmatmul.mubr.bf16.gmra.mrb[28].mxu1 %v1369_v35 }
 0x127   :  { %v459_v51 = vpop.f32.mrb[0].mxu0  ;;  %v539_v52 = vpop.f32.mrb[0].mxu1 }
 0x128   :  { %v2171_v53 = vadd.f32 %v459_v51, %v2166_v45  ;;  %v2174_v57 = vadd.f32 %v539_v52, %v2166_v45  ;;  %v461_v58 = vpop.f32.mrb[1].mxu0  ;;  %v541_v59 = vpop.f32.mrb[1].mxu1 }
 0x129   :  { %v2177_v60 = vadd.f32 %v461_v58, %v2168_v50  ;;  %v2180_v61 = vadd.f32 %v541_v59, %v2168_v50  ;;  %v463_v62 = vpop.f32.mrb[2].mxu0  ;;  %v543_v63 = vpop.f32.mrb[2].mxu1 }
 0x12a   :  { %v1403_v0 = vmul.f32 -1.442695, %v2171_v53  ;;  %v1435_v1 = vmul.f32 -1.442695, %v2174_v57  ;;  %v2185_v2 = vadd.f32 %v463_v62, %v2166_v45  ;;  %v2188_v3 = vadd.f32 %v543_v63, %v2166_v45  ;;  %v465_v4 = vpop.f32.mrb[3].mxu0  ;;  %v545_v5 = vpop.f32.mrb[3].mxu1 }
 0x12b   :  { %v1404_v6 = vmul.f32 -1.442695, %v2177_v60  ;;  %v1436_v7 = vmul.f32 -1.442695, %v2180_v61  ;;  %v2193_v8 = vadd.f32 %v465_v4, %v2168_v50  ;;  %v2196_v9 = vadd.f32 %v545_v5, %v2168_v50 }
 0x12c   :  { %1647 = vpow2.f32 %v1403_v0  ;;  %v1405_v10 = vmul.f32 -1.442695, %v2185_v2  ;;  %v1437_v11 = vmul.f32 -1.442695, %v2188_v3 }
 0x12d   :  { %1649 = vpow2.f32 %v1435_v1  ;;  %v1406_v12 = vmul.f32 -1.442695, %v2193_v8  ;;  %v1438_v15 = vmul.f32 -1.442695, %v2196_v9 }
 0x12e   :  { %1651 = vpow2.f32 %v1404_v6 }
 0x12f   :  { %1653 = vpow2.f32 %v1436_v7  ;;  %v469_v18 = vpop.f32.mrb[4].mxu0  ;;  %v549_v19 = vpop.f32.mrb[4].mxu1 }
 0x130   :  { %1655 = vpow2.f32 %v1405_v10  ;;  %v2203_v20 = vadd.f32 %v469_v18, %v2166_v45  ;;  %v2206_v21 = vadd.f32 %v549_v19, %v2166_v45  ;;  %v471_v22 = vpop.f32.mrb[5].mxu0  ;;  %v551_v23 = vpop.f32.mrb[5].mxu1 }
 0x131   :  { %1657 = vpow2.f32 %v1437_v11  ;;  %v2209_v24 = vadd.f32 %v471_v22, %v2168_v50  ;;  %v2212_v25 = vadd.f32 %v551_v23, %v2168_v50  ;;  %v473_v26 = vpop.f32.mrb[6].mxu0  ;;  %v553_v27 = vpop.f32.mrb[6].mxu1 }
 0x132   :  { %1659 = vpow2.f32 %v1406_v12  ;;  %v1407_v28 = vmul.f32 -1.442695, %v2203_v20  ;;  %v1439_v29 = vmul.f32 -1.442695, %v2206_v21  ;;  %v2217_v30 = vadd.f32 %v473_v26, %v2166_v45  ;;  %v475_v31 = vpop.f32.mrb[7].mxu0  ;;  %v555_v32 = vpop.f32.mrb[7].mxu1 }
 0x133   :  { %1661 = vpow2.f32 %v1438_v15  ;;  %v1408_v33 = vmul.f32 -1.442695, %v2209_v24  ;;  %v1440_v34 = vmul.f32 -1.442695, %v2212_v25  ;;  %v2225_v18 = vadd.f32 %v553_v27, %v2166_v45 }
 0x134   :  { %1663 = vpow2.f32 %v1407_v28  ;;  %v1409_v35 = vmul.f32 -1.442695, %v2217_v30  ;;  %v2228_v28 = vadd.f32 %v475_v31, %v2168_v50 }
 0x135   :  { %1665 = vpow2.f32 %v1439_v29 }
 0x136   :  { %v1648_v36 = vpop.eup %1647  ;;  %1667 = vpow2.f32 %v1408_v33 }
 0x137   :  { %v1650_v37 = vpop.eup %1649  ;;  %v810_v42 = vadd.f32 1.0, %v1648_v36  ;;  %1669 = vpow2.f32 %v1440_v34  ;;  %v479_v43 = vpop.f32.mrb[8].mxu0  ;;  %v2231_v34 = vadd.f32 %v555_v32, %v2168_v50 }
 0x138   :  { %v559_v44 = vpop.f32.mrb[8].mxu1  ;;  %v1652_v51 = vpop.eup %1651  ;;  %v842_v52 = vadd.f32 1.0, %v1650_v37  ;;  %1671 = vpow2.f32 %v1409_v35  ;;  %v1441_v37 = vmul.f32 -1.442695, %v2225_v18 }
 0x139   :  { %v481_v58 = vpop.f32.mrb[9].mxu0  ;;  %v561_v59 = vpop.f32.mrb[9].mxu1  ;;  %1673 = vrcp.f32 %v810_v42  ;;  %v811_v63 = vadd.f32 1.0, %v1652_v51  ;;  %v2235_v42 = vadd.f32 %v479_v43, %v2166_v45 }
 0x13a   :  { %v1654_v62 = vpop.eup %1653  ;;  %v483_v0 = vpop.f32.mrb[10].mxu0  ;;  %1675 = vrcp.f32 %v842_v52  ;;  %v2243_v32 = vadd.f32 %v481_v58, %v2168_v50 }
 0x13b   :  { %v563_v1 = vpop.f32.mrb[10].mxu1  ;;  %v1656_v4 = vpop.eup %1655  ;;  %v843_v5 = vadd.f32 1.0, %v1654_v62  ;;  %1677 = vrcp.f32 %v811_v63  ;;  %v2240_v63 = vadd.f32 %v559_v44, %v2166_v45 }
 0x13c   :  { %v485_v6 = vpop.f32.mrb[11].mxu0  ;;  %v1658_v7 = vpop.eup %1657  ;;  %v812_v10 = vadd.f32 1.0, %v1656_v4 }
 0x13d   :  { %v2222_v11 = vpop.f32.mrb[11].mxu1  ;;  %v1660_v12 = vpop.eup %1659  ;;  %1679 = vrcp.f32 %v843_v5  ;;  %v844_v15 = vadd.f32 1.0, %v1658_v7 }
 0x13e   :  { %v1662_v19 = vpop.eup %1661  ;;  %1681 = vrcp.f32 %v812_v10  ;;  %v813_v22 = vadd.f32 1.0, %v1660_v12  ;;  %v1410_v10 = vmul.f32 -1.442695, %v2228_v28  ;;  %v2251_v12 = vadd.f32 %v561_v59, %v2168_v50 }
 0x13f   :  { %v1664_v23 = vpop.eup %1663  ;;  %1683 = vrcp.f32 %v844_v15  ;;  %v845_v26 = vadd.f32 1.0, %v1662_v19  ;;  %v489_v35 = vpop.f32.mrb[12].mxu0  ;;  %v1411_v59 = vmul.f32 -1.442695, %v2235_v42 }
 0x140   :  { %v1666_v29 = vpop.eup %1665  ;;  %1685 = vrcp.f32 %v813_v22  ;;  %v814_v33 = vadd.f32 1.0, %v1664_v23  ;;  %v569_v51 = vpop.f32.mrb[12].mxu1  ;;  %v1442_v22 = vmul.f32 -1.442695, %v2231_v34  ;;  %v2259_v23 = vadd.f32 %v483_v0, %v2166_v45 }
 0x141   :  { %v1668_v36 = vpop.eup %1667  ;;  %1687 = vrcp.f32 %v845_v26  ;;  %v846_v27 = vadd.f32 1.0, %v1666_v29  ;;  %v2237_v52 = vpop.f32.mrb[13].mxu0  ;;  %v1412_v0 = vmul.f32 -1.442695, %v2243_v32  ;;  %v2294_v49 = vadd.f32 %v489_v35, %v2166_v45 }
 0x142   :  { %v1670_v31 = vpop.eup %1669  ;;  %1689 = vrcp.f32 %v814_v33  ;;  %v815_v62 = vadd.f32 1.0, %v1668_v36  ;;  %v2245_v4 = vpop.f32.mrb[13].mxu1  ;;  %v2266_v36 = vadd.f32 %v563_v1, %v2166_v45 }
 0x143   :  { %v2247_v5 = vpop.f32.mrb[14].mxu0  ;;  %v1672_v7 = vpop.eup %1671  ;;  %1691 = vrcp.f32 %v846_v27  ;;  %v847_v43 = vadd.f32 1.0, %v1670_v31 }
 0x144   :  { %v2253_v15 = vpop.f32.mrb[14].mxu1  ;;  %v2255_v19 = vpop.f32.mrb[15].mxu0  ;;  %1693 = vrcp.f32 %v815_v62  ;;  %v816_v58 = vadd.f32 1.0, %v1672_v7  ;;  %v1443_v62 = vmul.f32 -1.442695, %v2240_v63 }
 0x145   :  { %v1674_v44 = vpop.eup %1673  ;;  %v2261_v26 = vpop.f32.mrb[15].mxu1  ;;  %1695 = vrcp.f32 %v847_v43  ;;  %v2274_v43 = vadd.f32 %v485_v6, %v2168_v50  ;;  %v1445_v6 = vmul.f32 -1.442695, %v2266_v36 }
 0x146   :  { %v1676_v29 = vpop.eup %1675  ;;  %v1002_v33 = vmul.f32 %v1674_v44, %v2171_v53  ;;  %1697 = vrcp.f32 %v816_v58  ;;  %v1444_v53 = vmul.f32 -1.442695, %v2251_v12  ;;  %v2280_v58 = vadd.f32 %v2222_v11, %v2168_v50 }
 0x147   :  { %v1678_v27 = vpop.eup %1677  ;;  %v1034_v31 = vmul.f32 %v1676_v29, %v2174_v57  ;;  %1699 = vpow2.f32 %v1441_v37  ;;  %v1413_v57 = vmul.f32 -1.442695, %v2259_v23  ;;  %v2282_v29 = vpop.f32.mrb[16].mxu0 }
 0x148   :  { %v1680_v7 = vpop.eup %1679  ;;  %v1003_v55 = vmul.f32 %v1678_v27, %v2177_v60  ;;  %1701 = vpow2.f32 %v1410_v10  ;;  %v2284_v56 = vpop.f32.mrb[16].mxu1 }
 0x149   :  { %v1682_v44 = vpop.eup %1681  ;;  %v1035_v1 = vmul.f32 %v1680_v7, %v2180_v61  ;;  %1703 = vpow2.f32 %v1442_v22  ;;  %v2288_v54 = vpop.f32.mrb[17].mxu0 }
 0x14a   :  { %v1684_v60 = vpop.eup %1683  ;;  %v1499_v37 = vpack.c.bf16 %v1003_v55, %v1002_v33  ;;  %v1004_v27 = vmul.f32 %v1682_v44, %v2185_v2  ;;  %v2290_v61 = vpop.f32.mrb[17].mxu1  ;;  %1705 = vpow2.f32 %v1411_v59  ;;  %v2303_v44 = vadd.f32 %v569_v51, %v2166_v45 }
 0x14b   :  { %v1686_v10 = vpop.eup %1685  ;;  %v1515_v7 = vpack.c.bf16 %v1035_v1, %v1034_v31  ;;  %v1036_v11 = vmul.f32 %v1684_v60, %v2188_v3  ;;  %v2296_v47 = vpop.f32.mrb[18].mxu0  ;;  %1707 = vpow2.f32 %v1443_v62  ;;  %v1414_v60 = vmul.f32 -1.442695, %v2274_v43 }
 0x14c   :  { %v2298_v55 = vpop.f32.mrb[18].mxu1  ;;  %v1688_v2 = vpop.eup %1687  ;;  %v1258_v22 = vadd.bf16 %v1499_v37, %v2046_v13  ;;  %v1005_v33 = vmul.f32 %v1686_v10, %v2193_v8  ;;  %1709 = vpow2.f32 %v1412_v0  ;;  %v1446_v51 = vmul.f32 -1.442695, %v2280_v58 }
 0x14d   :  { %v2305_v31 = vpop.f32.mrb[19].mxu0  ;;  %v2307_v3 = vpop.f32.mrb[19].mxu1  ;;  %v1274_v35 = vadd.bf16 %v1515_v7, %v2052_v16  ;;  %v1037_v1 = vmul.f32 %v1688_v2, %v2196_v9  ;;  %1711 = vpow2.f32 %v1444_v53  ;;  %v1415_v16 = vmul.f32 -1.442695, %v2294_v49 }
 0x14e   :  { %v1690_v59 = vpop.eup %1689  ;;  %1290 = vst [vmem:[#allocation5] sm:$0xff] %v1258_v22  ;;  %v1500_v13 = vpack.c.bf16 %v1005_v33, %v1004_v27  ;;  %1713 = vpow2.f32 %v1413_v57  ;;  %v1447_v27 = vmul.f32 -1.442695, %v2303_v44 }
 0x14f   :  { %v1692_v48 = vpop.eup %1691  ;;  %v1006_v8 = vmul.f32 %v1690_v59, %v2203_v20  ;;  %1306 = vst [vmem:[#allocation5 + $0x80] sm:$0xff] %v1274_v35  ;;  %v1516_v37 = vpack.c.bf16 %v1037_v1, %v1036_v11  ;;  %1715 = vpow2.f32 %v1445_v6  ;;  %v2323_v11 = vpop.f32.mrb[20].mxu0 }
 0x150   :  { %v1694_v62 = vpop.eup %1693  ;;  %v1038_v10 = vmul.f32 %v1692_v48, %v2206_v21  ;;  %v1259_v0 = vadd.bf16 %v1500_v13, %v2048_v14  ;;  %1717 = vpow2.f32 %v1414_v60  ;;  %v2325_v48 = vpop.f32.mrb[20].mxu1 }
 0x151   :  { %v1696_v9 = vpop.eup %1695  ;;  %v1007_v7 = vmul.f32 %v1694_v62, %v2209_v24  ;;  %v1275_v53 = vadd.bf16 %v1516_v37, %v2054_v17  ;;  %1719 = vpow2.f32 %v1446_v51  ;;  %v2327_v14 = vpop.f32.mrb[21].mxu0 }
 0x152   :  { %v2319_v20 = vpop.eup %1697  ;;  %v1039_v2 = vmul.f32 %v1696_v9, %v2212_v25  ;;  %1291 = vst [vmem:[#allocation5 + $0x8] sm:$0xff] %v1259_v0  ;;  %v2329_v24 = vpop.f32.mrb[21].mxu1  ;;  %1721 = vpow2.f32 %v1415_v16  ;;  %v2343_v16 = vadd.f32 %v2237_v52, %v2168_v50  ;;  %v2347_v0 = vadd.f32 %v2245_v4, %v2168_v50 }
 0x153   :  { %v1700_v21 = vpop.eup %1699  ;;  %v1501_v57 = vpack.c.bf16 %v1007_v7, %v1006_v8  ;;  %1307 = vst [vmem:[#allocation5 + $0x88] sm:$0xff] %v1275_v53  ;;  %v2331_v17 = vpop.f32.mrb[22].mxu0  ;;  %1723 = vpow2.f32 %v1447_v27 }
 0x154   :  { %v1702_v6 = vpop.eup %1701  ;;  %v1517_v22 = vpack.c.bf16 %v1039_v2, %v1038_v10  ;;  %v848_v33 = vadd.f32 1.0, %v1700_v21  ;;  %v2333_v25 = vpop.f32.mrb[22].mxu1 }
 0x155   :  { %v1704_v59 = vpop.eup %1703  ;;  %v1260_v35 = vadd.bf16 %v1501_v57, %v2115_v38  ;;  %v817_v1 = vadd.f32 1.0, %v1702_v6  ;;  %v2336_v60 = vpop.f32.mrb[23].mxu0  ;;  %v1416_v57 = vmul.f32 -1.442695, %v2343_v16  ;;  %v2354_v6 = vadd.f32 %v2247_v5, %v2166_v45 }
 0x156   :  { %v2338_v13 = vpop.f32.mrb[23].mxu1  ;;  %v1706_v8 = vpop.eup %1705  ;;  %v1276_v51 = vadd.bf16 %v1517_v22, %v2119_v40  ;;  %1725 = vrcp.f32 %v848_v33  ;;  %v849_v62 = vadd.f32 1.0, %v1704_v59  ;;  %v2367_v5 = vadd.f32 %v2253_v15, %v2166_v45 }
 0x157   :  { %v1708_v37 = vpop.eup %1707  ;;  %1292 = vst [vmem:[#allocation5 + $0x10] sm:$0xff] %v1260_v35  ;;  %1727 = vrcp.f32 %v817_v1  ;;  %v818_v10 = vadd.f32 1.0, %v1706_v8  ;;  %v2349_v2 = vpop.f32.mrb[24].mxu0  ;;  %v1448_v35 = vmul.f32 -1.442695, %v2347_v0 }
 0x158   :  { %v1710_v38 = vpop.eup %1709  ;;  %1308 = vst [vmem:[#allocation5 + $0x90] sm:$0xff] %v1276_v51  ;;  %1729 = vrcp.f32 %v849_v62  ;;  %v850_v9 = vadd.f32 1.0, %v1708_v37  ;;  %v2356_v22 = vpop.f32.mrb[24].mxu1  ;;  %v2371_v37 = vadd.f32 %v2255_v19, %v2168_v50 }
 0x159   :  { %v1712_v7 = vpop.eup %1711  ;;  %1731 = vrcp.f32 %v818_v10  ;;  %v819_v40 = vadd.f32 1.0, %v1710_v38  ;;  %v2358_v4 = vpop.f32.mrb[25].mxu0 }
 0x15a   :  { %v1714_v27 = vpop.eup %1713  ;;  %1733 = vrcp.f32 %v850_v9  ;;  %v851_v53 = vadd.f32 1.0, %v1712_v7  ;;  %v2361_v1 = vpop.f32.mrb[25].mxu1 }
 0x15b   :  { %v1716_v21 = vpop.eup %1715  ;;  %1735 = vrcp.f32 %v819_v40  ;;  %v820_v52 = vadd.f32 1.0, %v1714_v27  ;;  %v2363_v8 = vpop.f32.mrb[26].mxu0  ;;  %v2379_v40 = vadd.f32 %v2261_v26, %v2168_v50  ;;  %v2383_v27 = vadd.f32 %v2282_v29, %v2166_v45 }
 0x15c   :  { %v1718_v33 = vpop.eup %1717  ;;  %1737 = vrcp.f32 %v851_v53  ;;  %v852_v59 = vadd.f32 1.0, %v1716_v21  ;;  %2659 = vst [vmem:[#allocation14_spill] sm:$0xff] %v2363_v8  ;;  %v2373_v10 = vpop.f32.mrb[26].mxu1  ;;  %v1417_v21 = vmul.f32 -1.442695, %v2354_v6  ;;  %v1008_v26 = vmul.f32 %v2319_v20, %v2217_v30 }
 0x15d   :  { %v1720_v51 = vpop.eup %1719  ;;  %1739 = vrcp.f32 %v820_v52  ;;  %v821_v62 = vadd.f32 1.0, %v1718_v33  ;;  %2660 = vst [vmem:[#allocation15_spill] sm:$0xff] %v2373_v10  ;;  %v2375_v38 = vpop.f32.mrb[27].mxu0  ;;  %v2390_v52 = vadd.f32 %v2284_v56, %v2166_v45  ;;  %v2396_v29 = vadd.f32 %v2288_v54, %v2168_v50 }
 0x15e   :  { %2661 = vst [vmem:[#allocation16_spill] sm:$0xff] %v2375_v38  ;;  %v1722_v9 = vpop.eup %1721  ;;  %1741 = vrcp.f32 %v852_v59  ;;  %v853_v7 = vadd.f32 1.0, %v1720_v51  ;;  %v2385_v15 = vpop.f32.mrb[27].mxu1  ;;  %v1450_v30 = vmul.f32 -1.442695, %v2379_v40 }
 0x15f   :  { %2662 = vst [vmem:[#allocation17_spill] sm:$0xff] %v2385_v15  ;;  %v1724_v53 = vpop.eup %1723  ;;  %1743 = vrcp.f32 %v821_v62  ;;  %v822_v19 = vadd.f32 1.0, %v1722_v9  ;;  %v1449_v9 = vmul.f32 -1.442695, %v2367_v5  ;;  %v1418_v15 = vmul.f32 -1.442695, %v2371_v37 }
 0x160   :  { %v1726_v33 = vpop.eup %1725  ;;  %1745 = vrcp.f32 %v853_v7  ;;  %v854_v59 = vadd.f32 1.0, %v1724_v53  ;;  %v1419_v20 = vmul.f32 -1.442695, %v2383_v27  ;;  %v2404_v7 = vpop.f32.mrb[28].mxu0 }
 0x161   :  { %v1728_v51 = vpop.eup %1727  ;;  %v1040_v62 = vmul.f32 %v1726_v33, %v2225_v18  ;;  %1747 = vrcp.f32 %v822_v19  ;;  %2663 = vst [vmem:[#allocation18_spill] sm:$0xff] %v2404_v7  ;;  %v2406_v54 = vpop.f32.mrb[28].mxu1  ;;  %v1451_v19 = vmul.f32 -1.442695, %v2390_v52  ;;  %v2412_v33 = vadd.f32 %v2290_v61, %v2168_v50 }
 0x162   :  { %v1730_v56 = vpop.eup %1729  ;;  %v1009_v38 = vmul.f32 %v1728_v51, %v2228_v28  ;;  %1749 = vrcp.f32 %v854_v59  ;;  %2664 = vst [vmem:[#allocation19_spill] sm:$0xff] %v2406_v54  ;;  %v2414_v28 = vpop.f32.mrb[29].mxu0  ;;  %v1420_v54 = vmul.f32 -1.442695, %v2396_v29 }
 0x163   :  { %v1732_v53 = vpop.eup %1731  ;;  %v1041_v18 = vmul.f32 %v1730_v56, %v2231_v34  ;;  %1751 = vpow2.f32 %v1416_v57  ;;  %2665 = vst [vmem:[#allocation20_spill] sm:$0xff] %v2414_v28  ;;  %v2416_v59 = vpop.f32.mrb[29].mxu1  ;;  %v2427_v28 = vadd.f32 %v2296_v47, %v2166_v45 }
 0x164   :  { %2666 = vst [vmem:[#allocation21_spill] sm:$0xff] %v2416_v59  ;;  %v1734_v51 = vpop.eup %1733  ;;  %v1502_v10 = vpack.c.bf16 %v1009_v38, %v1008_v26  ;;  %v1010_v7 = vmul.f32 %v1732_v53, %v2235_v42  ;;  %1753 = vpow2.f32 %v1448_v35  ;;  %v2420_v8 = vpop.f32.mrb[30].mxu0  ;;  %v2443_v53 = vadd.f32 %v2305_v31, %v2168_v50 }
 0x165   :  { %v2422_v34 = vpop.f32.mrb[30].mxu1  ;;  %v1736_v57 = vpop.eup %1735  ;;  %v1518_v56 = vpack.c.bf16 %v1041_v18, %v1040_v62  ;;  %v1042_v61 = vmul.f32 %v1734_v51, %v2240_v63  ;;  %1755 = vpow2.f32 %v1417_v21  ;;  %v2437_v62 = vadd.f32 %v2298_v55, %v2166_v45 }
 0x166   :  { %v2429_v59 = vpop.f32.mrb[31].mxu0  ;;  %v2431_v38 = vpop.f32.mrb[31].mxu1  ;;  %v1261_v35 = vadd.bf16 %v1502_v10, %v2117_v39  ;;  %v1011_v26 = vmul.f32 %v1736_v57, %v2243_v32  ;;  %1757 = vpow2.f32 %v1449_v9  ;;  %v1452_v10 = vmul.f32 -1.442695, %v2412_v33 }
 0x167   :  { %v1738_v42 = vpop.eup %1737  ;;  %v1277_v21 = vadd.bf16 %v1518_v56, %v2121_v41  ;;  %1759 = vpow2.f32 %v1418_v15 }
 0x168   :  { %v1740_v63 = vpop.eup %1739  ;;  %v1043_v47 = vmul.f32 %v1738_v42, %v2251_v12  ;;  %1293 = vst [vmem:[#allocation5 + $0x18] sm:$0xff] %v1261_v35  ;;  %v1503_v39 = vpack.c.bf16 %v1011_v26, %v1010_v7  ;;  %1761 = vpow2.f32 %v1450_v30  ;;  %v1421_v12 = vmul.f32 -1.442695, %v2427_v28  ;;  %v2667_v30 = vld [vmem:[#allocation9_spill] sm:$0xff] }
 0x169   :  { %v1742_v18 = vpop.eup %1741  ;;  %v1012_v32 = vmul.f32 %v1740_v63, %v2259_v23  ;;  %1309 = vst [vmem:[#allocation5 + $0x98] sm:$0xff] %v1277_v21  ;;  %1763 = vpow2.f32 %v1419_v20  ;;  %v1453_v7 = vmul.f32 -1.442695, %v2437_v62  ;;  %v2669_v21 = vld [vmem:[#allocation10_spill] sm:$0xff] }
 0x16a   :  { %v1744_v55 = vpop.eup %1743  ;;  %v1519_v9 = vpack.c.bf16 %v1043_v47, %v1042_v61  ;;  %v1044_v41 = vmul.f32 %v1742_v18, %v2266_v36  ;;  %v1262_v31 = vadd.bf16 %v1503_v39, %v2131_v46  ;;  %1765 = vpow2.f32 %v1451_v19  ;;  %v2668_v19 = vld [vmem:[#allocation8_spill] sm:$0xff] }
 0x16b   :  { %v1746_v15 = vpop.eup %1745  ;;  %v1013_v51 = vmul.f32 %v1744_v55, %v2274_v43  ;;  %1767 = vpow2.f32 %v1420_v54  ;;  %v1422_v61 = vmul.f32 -1.442695, %v2443_v53 }
 0x16c   :  { %v1748_v23 = vpop.eup %1747  ;;  %v1278_v57 = vadd.bf16 %v1519_v9, %v2667_v30  ;;  %v1045_v56 = vmul.f32 %v1746_v15, %v2280_v58  ;;  %1294 = vst [vmem:[#allocation5 + $0x20] sm:$0xff] %v1262_v31  ;;  %1769 = vpow2.f32 %v1452_v10  ;;  %v2459_v10 = vadd.f32 %v2307_v3, %v2168_v50 }
 0x16d   :  { %v1750_v36 = vpop.eup %1749  ;;  %v1504_v20 = vpack.c.bf16 %v1013_v51, %v1012_v32  ;;  %1771 = vpow2.f32 %v1421_v12  ;;  %v2467_v31 = vadd.f32 %v2325_v48, %v2166_v45  ;;  %v2471_v3 = vadd.f32 %v2327_v14, %v2168_v50 }
 0x16e   :  { %v1752_v42 = vpop.eup %1751  ;;  %1310 = vst [vmem:[#allocation5 + $0xa0] sm:$0xff] %v1278_v57  ;;  %v1520_v46 = vpack.c.bf16 %v1045_v56, %v1044_v41  ;;  %1773 = vpow2.f32 %v1453_v7  ;;  %v2463_v41 = vadd.f32 %v2323_v11, %v2166_v45  ;;  %v1454_v11 = vmul.f32 -1.442695, %v2459_v10 }
 0x16f   :  { %v1754_v43 = vpop.eup %1753  ;;  %v1263_v35 = vadd.bf16 %v1504_v20, %v2668_v19  ;;  %v823_v26 = vadd.f32 1.0, %v1752_v42  ;;  %1775 = vpow2.f32 %v1422_v61  ;;  %v2477_v48 = vadd.f32 %v2329_v24, %v2168_v50 }
 0x170   :  { %v1756_v63 = vpop.eup %1755  ;;  %v1279_v47 = vadd.bf16 %v1520_v46, %v2669_v21  ;;  %v855_v58 = vadd.f32 1.0, %v1754_v43  ;;  %v1423_v20 = vmul.f32 -1.442695, %v2463_v41  ;;  %v1455_v14 = vmul.f32 -1.442695, %v2467_v31 }
 0x171   :  { %v1758_v54 = vpop.eup %1757  ;;  %1295 = vst [vmem:[#allocation5 + $0x28] sm:$0xff] %v1263_v35  ;;  %1777 = vrcp.f32 %v823_v26  ;;  %v824_v18 = vadd.f32 1.0, %v1756_v63  ;;  %v2482_v43 = vadd.f32 %v2331_v17, %v2166_v45  ;;  %v1424_v26 = vmul.f32 -1.442695, %v2471_v3 }
 0x172   :  { %v1760_v39 = vpop.eup %1759  ;;  %1311 = vst [vmem:[#allocation5 + $0xa8] sm:$0xff] %v1279_v47  ;;  %1779 = vrcp.f32 %v855_v58  ;;  %v856_v32 = vadd.f32 1.0, %v1758_v54  ;;  %v2487_v63 = vadd.f32 %v2333_v25, %v2166_v45  ;;  %v1014_v21 = vmul.f32 %v1748_v23, %v2294_v49 }
 0x173   :  { %v1762_v55 = vpop.eup %1761  ;;  %1781 = vrcp.f32 %v824_v18  ;;  %v825_v9 = vadd.f32 1.0, %v1760_v39  ;;  %v2492_v58 = vadd.f32 %v2336_v60, %v2168_v50  ;;  %v1046_v54 = vmul.f32 %v1750_v36, %v2303_v44 }
 0x174   :  { %v1764_v12 = vpop.eup %1763  ;;  %1783 = vrcp.f32 %v856_v32  ;;  %v857_v15 = vadd.f32 1.0, %v1762_v55  ;;  %v1456_v39 = vmul.f32 -1.442695, %v2477_v48  ;;  %v1425_v55 = vmul.f32 -1.442695, %v2482_v43 }
 0x175   :  { %v1766_v51 = vpop.eup %1765  ;;  %1785 = vrcp.f32 %v825_v9  ;;  %v826_v7 = vadd.f32 1.0, %v1764_v12  ;;  %v2500_v49 = vadd.f32 %v2338_v13, %v2168_v50  ;;  %v1457_v44 = vmul.f32 -1.442695, %v2487_v63 }
 0x176   :  { %v1768_v30 = vpop.eup %1767  ;;  %1787 = vrcp.f32 %v857_v15  ;;  %v858_v57 = vadd.f32 1.0, %v1766_v51  ;;  %v2506_v36 = vadd.f32 %v2349_v2, %v2166_v45  ;;  %v1426_v15 = vmul.f32 -1.442695, %v2492_v58 }
 0x177   :  { %v1770_v56 = vpop.eup %1769  ;;  %1789 = vrcp.f32 %v826_v7  ;;  %v827_v61 = vadd.f32 1.0, %v1768_v30 }
 0x178   :  { %v1772_v42 = vpop.eup %1771  ;;  %1791 = vrcp.f32 %v858_v57  ;;  %v859_v46 = vadd.f32 1.0, %v1770_v56  ;;  %v2670_v57 = vld [vmem:[#allocation11_spill] sm:$0xff] }
 0x179   :  { %v1774_v19 = vpop.eup %1773  ;;  %1793 = vrcp.f32 %v827_v61  ;;  %v828_v35 = vadd.f32 1.0, %v1772_v42  ;;  %v2671_v61 = vld [vmem:[#allocation13_spill] sm:$0xff] }
 0x17a   :  { %v1776_v24 = vpop.eup %1775  ;;  %1795 = vrcp.f32 %v859_v46  ;;  %v860_v47 = vadd.f32 1.0, %v1774_v19 }
 0x17b   :  { %v1778_v17 = vpop.eup %1777  ;;  %1797 = vrcp.f32 %v828_v35  ;;  %v829_v18 = vadd.f32 1.0, %v1776_v24  ;;  %v2672_v24 = vld [vmem:[#allocation12_spill] sm:$0xff] }
 0x17c   :  { %v1780_v32 = vpop.eup %1779  ;;  %v1015_v25 = vmul.f32 %v1778_v17, %v2343_v16  ;;  %1799 = vrcp.f32 %v860_v47 }
 0x17d   :  { %v1782_v23 = vpop.eup %1781  ;;  %v1047_v60 = vmul.f32 %v1780_v32, %v2347_v0  ;;  %1801 = vrcp.f32 %v829_v18  ;;  %v2513_v0 = vadd.f32 %v2356_v22, %v2166_v45 }
 0x17e   :  { %v1784_v9 = vpop.eup %1783  ;;  %v1505_v12 = vpack.c.bf16 %v1015_v25, %v1014_v21  ;;  %v1016_v16 = vmul.f32 %v1782_v23, %v2354_v6  ;;  %1803 = vpow2.f32 %v1454_v11  ;;  %v1458_v6 = vmul.f32 -1.442695, %v2500_v49 }
 0x17f   :  { %v1786_v51 = vpop.eup %1785  ;;  %v1521_v13 = vpack.c.bf16 %v1047_v60, %v1046_v54  ;;  %v1048_v7 = vmul.f32 %v1784_v9, %v2367_v5  ;;  %1805 = vpow2.f32 %v1423_v20  ;;  %v2522_v5 = vadd.f32 %v2358_v4, %v2168_v50  ;;  %v1903_v54 = vld [vmem:[#allocation2 + $0xb8] sm:$0xff] }
 0x180   :  { %v1788_v30 = vpop.eup %1787  ;;  %v1264_v2 = vadd.bf16 %v1505_v12, %v2670_v57  ;;  %v1017_v56 = vmul.f32 %v1786_v51, %v2371_v37  ;;  %1807 = vpow2.f32 %v1455_v14  ;;  %v2527_v37 = vadd.f32 %v2361_v1, %v2168_v50 }
 0x181   :  { %v1790_v11 = vpop.eup %1789  ;;  %v1280_v42 = vadd.bf16 %v1521_v13, %v2671_v61  ;;  %v1049_v46 = vmul.f32 %v1788_v30, %v2379_v40  ;;  %1809 = vpow2.f32 %v1424_v26  ;;  %v1427_v26 = vmul.f32 -1.442695, %v2506_v36 }
 0x182   :  { %v1792_v22 = vpop.eup %1791  ;;  %1296 = vst [vmem:[#allocation5 + $0x30] sm:$0xff] %v1264_v2  ;;  %v1506_v20 = vpack.c.bf16 %v1017_v56, %v1016_v16  ;;  %v1018_v19 = vmul.f32 %v1790_v11, %v2383_v27  ;;  %1811 = vpow2.f32 %v1456_v39  ;;  %v1459_v27 = vmul.f32 -1.442695, %v2513_v0  ;;  %v1905_v16 = vld [vmem:[#allocation2 + $0xc0] sm:$0xff]  ;;  %v1906_v56 = vld [vmem:[#allocation2 + $0x48] sm:$0xff] }
 0x183   :  { %v1794_v14 = vpop.eup %1793  ;;  %1312 = vst [vmem:[#allocation5 + $0xb0] sm:$0xff] %v1280_v42  ;;  %v1522_v35 = vpack.c.bf16 %v1049_v46, %v1048_v7  ;;  %v1050_v40 = vmul.f32 %v1792_v22, %v2390_v52  ;;  %1813 = vpow2.f32 %v1425_v55  ;;  %v1428_v39 = vmul.f32 -1.442695, %v2522_v5  ;;  %v2673_v42 = vld [vmem:[#allocation14_spill] sm:$0xff] }
 0x184   :  { %v1796_v4 = vpop.eup %1795  ;;  %v1265_v21 = vadd.bf16 %v1506_v20, %v2672_v24  ;;  %v1019_v47 = vmul.f32 %v1794_v14, %v2396_v29  ;;  %1815 = vpow2.f32 %v1457_v44  ;;  %v1460_v29 = vmul.f32 -1.442695, %v2527_v37  ;;  %v1904_v44 = vld [vmem:[#allocation2 + $0x40] sm:$0xff] }
 0x185   :  { %v1798_v17 = vpop.eup %1797  ;;  %v1281_v1 = vadd.bf16 %v1903_v54, %v1522_v35  ;;  %v1051_v18 = vmul.f32 %v1796_v4, %v2412_v33  ;;  %1817 = vpow2.f32 %v1426_v15  ;;  %v2543_v46 = vadd.f32 %v2673_v42, %v2166_v45 }
 0x186   :  { %v2536_v52 = vpop.eup %1799  ;;  %1297 = vst [vmem:[#allocation5 + $0x38] sm:$0xff] %v1265_v21  ;;  %v1507_v32 = vpack.c.bf16 %v1019_v47, %v1018_v19  ;;  %v1020_v25 = vmul.f32 %v1798_v17, %v2427_v28  ;;  %1819 = vpow2.f32 %v1458_v6 }
 0x187   :  { %v1802_v55 = vpop.eup %1801  ;;  %1313 = vst [vmem:[#allocation5 + $0xb8] sm:$0xff] %v1281_v1  ;;  %v1523_v23 = vpack.c.bf16 %v1051_v18, %v1050_v40  ;;  %1821 = vpow2.f32 %v1427_v26  ;;  %v2674_v26 = vld [vmem:[#allocation15_spill] sm:$0xff]  ;;  %v1429_v47 = vmul.f32 -1.442695, %v2543_v46  ;;  %v2676_v18 = vld [vmem:[#allocation17_spill] sm:$0xff] }
 0x188   :  { %v1804_v60 = vpop.eup %1803  ;;  %v1266_v9 = vadd.bf16 %v1904_v44, %v1507_v32  ;;  %v1021_v33 = vmul.f32 %v1802_v55, %v2443_v53  ;;  %1823 = vpow2.f32 %v1459_v27  ;;  %v2547_v4 = vadd.f32 %v2674_v26, %v2166_v45  ;;  %v2675_v27 = vld [vmem:[#allocation16_spill] sm:$0xff]  ;;  %v2677_v32 = vld [vmem:[#allocation18_spill] sm:$0xff] }
 0x189   :  { %v1806_v12 = vpop.eup %1805  ;;  %v1282_v15 = vadd.bf16 %v1905_v16, %v1523_v23  ;;  %v861_v51 = vadd.f32 1.0, %v1804_v60  ;;  %1825 = vpow2.f32 %v1428_v39  ;;  %v2552_v17 = vadd.f32 %v2675_v27, %v2168_v50  ;;  %v2678_v23 = vld [vmem:[#allocation19_spill] sm:$0xff]  ;;  %v2679_v44 = vld [vmem:[#allocation20_spill] sm:$0xff] }
 0x18a   :  { %v1808_v13 = vpop.eup %1807  ;;  %1298 = vst [vmem:[#allocation5 + $0x40] sm:$0xff] %v1266_v9  ;;  %v1508_v28 = vpack.c.bf16 %v1021_v33, %v1020_v25  ;;  %v830_v7 = vadd.f32 1.0, %v1806_v12  ;;  %1827 = vpow2.f32 %v1460_v29  ;;  %v2556_v39 = vadd.f32 %v2676_v18, %v2168_v50 }
 0x18b   :  { %v1810_v30 = vpop.eup %1809  ;;  %1314 = vst [vmem:[#allocation5 + $0xc0] sm:$0xff] %v1282_v15  ;;  %1829 = vrcp.f32 %v861_v51  ;;  %v862_v57 = vadd.f32 1.0, %v1808_v13  ;;  %v2560_v25 = vadd.f32 %v2677_v32, %v2166_v45  ;;  %v2564_v60 = vadd.f32 %v2678_v23, %v2166_v45 }
 0x18c   :  { %v1812_v2 = vpop.eup %1811  ;;  %v1267_v6 = vadd.bf16 %v1906_v56, %v1508_v28  ;;  %1831 = vrcp.f32 %v830_v7  ;;  %v831_v53 = vadd.f32 1.0, %v1810_v30  ;;  %v2568_v9 = vadd.f32 %v2679_v44, %v2168_v50  ;;  %v2680_v7 = vld [vmem:[#allocation21_spill] sm:$0xff] }
 0x18d   :  { %v1814_v11 = vpop.eup %1813  ;;  %1833 = vrcp.f32 %v862_v57  ;;  %v863_v61 = vadd.f32 1.0, %v1812_v2  ;;  %v1052_v12 = vmul.f32 %v2536_v52, %v2437_v62  ;;  %v1461_v15 = vmul.f32 -1.442695, %v2547_v4 }
 0x18e   :  { %v1816_v22 = vpop.eup %1815  ;;  %1299 = vst [vmem:[#allocation5 + $0x48] sm:$0xff] %v1267_v6  ;;  %1835 = vrcp.f32 %v831_v53  ;;  %v832_v20 = vadd.f32 1.0, %v1814_v11  ;;  %v1430_v28 = vmul.f32 -1.442695, %v2552_v17  ;;  %v2576_v30 = vadd.f32 %v2680_v7, %v2168_v50  ;;  %v1911_v7 = vld [vmem:[#allocation2 + $0xd8] sm:$0xff] }
 0x18f   :  { %v1818_v19 = vpop.eup %1817  ;;  %1837 = vrcp.f32 %v863_v61  ;;  %v864_v14 = vadd.f32 1.0, %v1816_v22  ;;  %v1462_v56 = vmul.f32 -1.442695, %v2556_v39  ;;  %v1431_v62 = vmul.f32 -1.442695, %v2560_v25 }
 0x190   :  { %v1820_v35 = vpop.eup %1819  ;;  %1839 = vrcp.f32 %v832_v20  ;;  %v833_v40 = vadd.f32 1.0, %v1818_v19  ;;  %v1463_v53 = vmul.f32 -1.442695, %v2564_v60  ;;  %v1432_v11 = vmul.f32 -1.442695, %v2568_v9 }
 0x191   :  { %v1822_v24 = vpop.eup %1821  ;;  %1841 = vrcp.f32 %v864_v14  ;;  %v865_v21 = vadd.f32 1.0, %v1820_v35  ;;  %v2593_v14 = vadd.f32 %v2422_v34, %v2166_v45 }
 0x192   :  { %v1824_v54 = vpop.eup %1823  ;;  %1843 = vrcp.f32 %v833_v40  ;;  %v834_v1 = vadd.f32 1.0, %v1822_v24  ;;  %v1907_v40 = vld [vmem:[#allocation2 + $0xc8] sm:$0xff] }
 0x193   :  { %v1826_v29 = vpop.eup %1825  ;;  %1845 = vrcp.f32 %v865_v21  ;;  %v866_v55 = vadd.f32 1.0, %v1824_v54 }
 0x194   :  { %v1828_v33 = vpop.eup %1827  ;;  %1847 = vrcp.f32 %v834_v1  ;;  %v835_v16 = vadd.f32 1.0, %v1826_v29  ;;  %v1909_v29 = vld [vmem:[#allocation2 + $0xd0] sm:$0xff] }
 0x195   :  { %v1830_v51 = vpop.eup %1829  ;;  %1849 = vrcp.f32 %v866_v55  ;;  %v867_v13 = vadd.f32 1.0, %v1828_v33 }
 0x196   :  { %v1832_v57 = vpop.eup %1831  ;;  %v1053_v2 = vmul.f32 %v1830_v51, %v2459_v10  ;;  %1851 = vrcp.f32 %v835_v16  ;;  %v2587_v10 = vadd.f32 %v2420_v8, %v2166_v45  ;;  %v2598_v8 = vadd.f32 %v2429_v59, %v2168_v50  ;;  %v1908_v59 = vld [vmem:[#allocation2 + $0x50] sm:$0xff]  ;;  %v1910_v51 = vld [vmem:[#allocation2 + $0x58] sm:$0xff] }
 0x197   :  { %v1834_v52 = vpop.eup %1833  ;;  %v1022_v6 = vmul.f32 %v1832_v57, %v2463_v41  ;;  %1853 = vrcp.f32 %v867_v13  ;;  %v1464_v41 = vmul.f32 -1.442695, %v2576_v30 }
 0x198   :  { %v1836_v61 = vpop.eup %1835  ;;  %v1524_v42 = vpack.c.bf16 %v1053_v2, %v1052_v12  ;;  %v1054_v22 = vmul.f32 %v1834_v52, %v2467_v31  ;;  %1855 = vpow2.f32 %v1429_v47  ;;  %v2603_v47 = vadd.f32 %v2431_v38, %v2168_v50 }
 0x199   :  { %v1838_v20 = vpop.eup %1837  ;;  %v1023_v19 = vmul.f32 %v1836_v61, %v2471_v3  ;;  %1857 = vpow2.f32 %v1461_v15  ;;  %v1434_v55 = vmul.f32 -1.442695, %v2598_v8 }
 0x19a   :  { %v1840_v35 = vpop.eup %1839  ;;  %v1283_v26 = vadd.bf16 %v1907_v40, %v1524_v42  ;;  %v1055_v31 = vmul.f32 %v1838_v20, %v2477_v48  ;;  %1859 = vpow2.f32 %v1430_v28  ;;  %v1433_v48 = vmul.f32 -1.442695, %v2587_v10 }
 0x19b   :  { %v1842_v24 = vpop.eup %1841  ;;  %v1509_v21 = vpack.c.bf16 %v1023_v19, %v1022_v6  ;;  %v1024_v3 = vmul.f32 %v1840_v35, %v2482_v43  ;;  %1861 = vpow2.f32 %v1462_v56  ;;  %v1465_v43 = vmul.f32 -1.442695, %v2593_v14 }
 0x19c   :  { %v1844_v45 = vpop.eup %1843  ;;  %1315 = vst [vmem:[#allocation5 + $0xc8] sm:$0xff] %v1283_v26  ;;  %v1525_v34 = vpack.c.bf16 %v1055_v31, %v1054_v22  ;;  %v1056_v27 = vmul.f32 %v1842_v24, %v2487_v63  ;;  %1863 = vpow2.f32 %v1431_v62  ;;  %v1466_v33 = vmul.f32 -1.442695, %v2603_v47  ;;  %v1913_v22 = vld [vmem:[#allocation2 + $0xe0] sm:$0xff] }
 0x19d   :  { %v1846_v54 = vpop.eup %1845  ;;  %v1268_v1 = vadd.bf16 %v1908_v59, %v1509_v21  ;;  %v1025_v18 = vmul.f32 %v1844_v45, %v2492_v58  ;;  %1865 = vpow2.f32 %v1463_v53 }
 0x19e   :  { %v1848_v32 = vpop.eup %1847  ;;  %v1284_v50 = vadd.bf16 %v1909_v29, %v1525_v34  ;;  %v1057_v38 = vmul.f32 %v1846_v54, %v2500_v49  ;;  %1867 = vpow2.f32 %v1432_v11  ;;  %v1912_v11 = vld [vmem:[#allocation2 + $0x60] sm:$0xff] }
 0x19f   :  { %v1850_v63 = vpop.eup %1849  ;;  %1300 = vst [vmem:[#allocation5 + $0x50] sm:$0xff] %v1268_v1  ;;  %v1510_v23 = vpack.c.bf16 %v1025_v18, %v1024_v3  ;;  %v1026_v44 = vmul.f32 %v1848_v32, %v2506_v36  ;;  %1869 = vpow2.f32 %v1464_v41 }
 0x1a0   :  { %v1852_v58 = vpop.eup %1851  ;;  %1316 = vst [vmem:[#allocation5 + $0xd0] sm:$0xff] %v1284_v50  ;;  %v1526_v12 = vpack.c.bf16 %v1057_v38, %v1056_v27  ;;  %v1058_v16 = vmul.f32 %v1850_v63, %v2513_v0  ;;  %1871 = vpow2.f32 %v1433_v48 }
 0x1a1   :  { %v1854_v15 = vpop.eup %1853  ;;  %v1269_v49 = vadd.bf16 %v1910_v51, %v1510_v23  ;;  %v1027_v13 = vmul.f32 %v1852_v58, %v2522_v5  ;;  %1873 = vpow2.f32 %v1465_v43 }
 0x1a2   :  { %v1856_v28 = vpop.eup %1855  ;;  %v1285_v57 = vadd.bf16 %v1911_v7, %v1526_v12  ;;  %v1059_v36 = vmul.f32 %v1854_v15, %v2527_v37  ;;  %1875 = vpow2.f32 %v1434_v55 }
 0x1a3   :  { %v1858_v2 = vpop.eup %1857  ;;  %1301 = vst [vmem:[#allocation5 + $0x58] sm:$0xff] %v1269_v49  ;;  %v1511_v56 = vpack.c.bf16 %v1027_v13, %v1026_v44  ;;  %v836_v62 = vadd.f32 1.0, %v1856_v28  ;;  %1877 = vpow2.f32 %v1466_v33  ;;  %v1915_v13 = vld [vmem:[#allocation2 + $0xe8] sm:$0xff] }
 0x1a4   :  { %v1860_v52 = vpop.eup %1859  ;;  %1317 = vst [vmem:[#allocation5 + $0xd8] sm:$0xff] %v1285_v57  ;;  %v1527_v0 = vpack.c.bf16 %v1059_v36, %v1058_v16  ;;  %v868_v6 = vadd.f32 1.0, %v1858_v2 }
 0x1a5   :  { %v1862_v53 = vpop.eup %1861  ;;  %v1270_v61 = vadd.bf16 %v1912_v11, %v1511_v56  ;;  %1879 = vrcp.f32 %v836_v62  ;;  %v837_v5 = vadd.f32 1.0, %v1860_v52  ;;  %v1916_v56 = vld [vmem:[#allocation2 + $0x70] sm:$0xff] }
 0x1a6   :  { %v1864_v42 = vpop.eup %1863  ;;  %v1286_v20 = vadd.bf16 %v1913_v22, %v1527_v0  ;;  %1881 = vrcp.f32 %v868_v6  ;;  %v869_v37 = vadd.f32 1.0, %v1862_v53  ;;  %v1917_v52 = vld [vmem:[#allocation2 + $0xf0] sm:$0xff]  ;;  %v1918_v53 = vld [vmem:[#allocation2 + $0x78] sm:$0xff] }
 0x1a7   :  { %v1866_v19 = vpop.eup %1865  ;;  %1302 = vst [vmem:[#allocation5 + $0x60] sm:$0xff] %v1270_v61  ;;  %1883 = vrcp.f32 %v837_v5  ;;  %v838_v41 = vadd.f32 1.0, %v1864_v42  ;;  %v1919_v61 = vld [vmem:[#allocation2 + $0xf8] sm:$0xff] }
 0x1a8   :  { %v1868_v35 = vpop.eup %1867  ;;  %1318 = vst [vmem:[#allocation5 + $0xe0] sm:$0xff] %v1286_v20  ;;  %1885 = vrcp.f32 %v869_v37  ;;  %v870_v40 = vadd.f32 1.0, %v1866_v19 }
 0x1a9   :  { %v1870_v26 = vpop.eup %1869  ;;  %1887 = vrcp.f32 %v838_v41  ;;  %v839_v31 = vadd.f32 1.0, %v1868_v35 }
 0x1aa   :  { %v1872_v24 = vpop.eup %1871  ;;  %1889 = vrcp.f32 %v870_v40  ;;  %v871_v21 = vadd.f32 1.0, %v1870_v26 }
 0x1ab   :  { %v1874_v3 = vpop.eup %1873  ;;  %1891 = vrcp.f32 %v839_v31  ;;  %v840_v45 = vadd.f32 1.0, %v1872_v24 }
 0x1ac   :  { %v1876_v34 = vpop.eup %1875  ;;  %1893 = vrcp.f32 %v871_v21  ;;  %v872_v27 = vadd.f32 1.0, %v1874_v3 }
 0x1ad   :  { %v1878_v48 = vpop.eup %1877  ;;  %1895 = vrcp.f32 %v840_v45  ;;  %v841_v54 = vadd.f32 1.0, %v1876_v34 }
 0x1ae   :  { %1897 = vrcp.f32 %v872_v27  ;;  %v873_v59 = vadd.f32 1.0, %v1878_v48 }
 0x1af   :  { %v1880_v1 = vpop.eup %1879  ;;  %1899 = vrcp.f32 %v841_v54 }
 0x1b0   :  { %v1882_v18 = vpop.eup %1881  ;;  %v1028_v43 = vmul.f32 %v1880_v1, %v2543_v46  ;;  %1901 = vrcp.f32 %v873_v59  ;;  %v1914_v46 = vld [vmem:[#allocation2 + $0x68] sm:$0xff] }
 0x1b1   :  { %v1884_v32 = vpop.eup %1883  ;;  %v1060_v29 = vmul.f32 %v1882_v18, %v2547_v4 }
 0x1b2   :  { %v1886_v50 = vpop.eup %1885  ;;  %v1029_v38 = vmul.f32 %v1884_v32, %v2552_v17 }
 0x1b3   :  { %v1888_v55 = vpop.eup %1887  ;;  %v1061_v63 = vmul.f32 %v1886_v50, %v2556_v39 }
 0x1b4   :  { %v1890_v23 = vpop.eup %1889  ;;  %v1512_v44 = vpack.c.bf16 %v1029_v38, %v1028_v43  ;;  %v1030_v33 = vmul.f32 %v1888_v55, %v2560_v25 }
 0x1b5   :  { %v1892_v58 = vpop.eup %1891  ;;  %v1528_v12 = vpack.c.bf16 %v1061_v63, %v1060_v29  ;;  %v1062_v16 = vmul.f32 %v1890_v23, %v2564_v60 }
 0x1b6   :  { %v1894_v15 = vpop.eup %1893  ;;  %v1271_v51 = vadd.bf16 %v1914_v46, %v1512_v44  ;;  %v1031_v49 = vmul.f32 %v1892_v58, %v2568_v9 }
 0x1b7   :  { %v1896_v4 = vpop.eup %1895  ;;  %v1287_v28 = vadd.bf16 %v1915_v13, %v1528_v12  ;;  %v1063_v17 = vmul.f32 %v1894_v15, %v2576_v30 }
 0x1b8   :  { %v1898_v7 = vpop.eup %1897  ;;  %1303 = vst [vmem:[#allocation5 + $0x68] sm:$0xff] %v1271_v51  ;;  %v1513_v39 = vpack.c.bf16 %v1031_v49, %v1030_v33  ;;  %v1032_v57 = vmul.f32 %v1896_v4, %v2587_v10 }
 0x1b9   :  { %v1900_v25 = vpop.eup %1899  ;;  %1319 = vst [vmem:[#allocation5 + $0xe8] sm:$0xff] %v1287_v28  ;;  %v1529_v36 = vpack.c.bf16 %v1063_v17, %v1062_v16  ;;  %v1064_v60 = vmul.f32 %v1898_v7, %v2593_v14 }
 0x1ba   :  { %v1902_v2 = vpop.eup %1901  ;;  %v1272_v62 = vadd.bf16 %v1916_v56, %v1513_v39  ;;  %v1033_v9 = vmul.f32 %v1900_v25, %v2598_v8 }
 0x1bb   :  { %v1288_v0 = vadd.bf16 %v1917_v52, %v1529_v36  ;;  %v1065_v6 = vmul.f32 %v1902_v2, %v2603_v47 }
 0x1bc   :  { %1304 = vst [vmem:[#allocation5 + $0x70] sm:$0xff] %v1272_v62  ;;  %v1514_v30 = vpack.c.bf16 %v1033_v9, %v1032_v57 }
 0x1bd   :  { %1320 = vst [vmem:[#allocation5 + $0xf0] sm:$0xff] %v1288_v0  ;;  %v1530_v10 = vpack.c.bf16 %v1065_v6, %v1064_v60 }
 0x1be   :  { %v1273_v11 = vadd.bf16 %v1918_v53, %v1514_v30 }
 0x1bf   :  { %v1289_v5 = vadd.bf16 %v1919_v61, %v1530_v10 }
 0x1c0   :  { %1305 = vst [vmem:[#allocation5 + $0x78] sm:$0xff] %v1273_v11 }
 0x1c1   :  { %1321 = vst [vmem:[#allocation5 + $0xf8] sm:$0xff] %v1289_v5 }
 0x1c2   :  { %1953 = shalt.err (!%p1950_p12)
}
 0x1c3   :  { %s1954_s15 = scalar_lea.hbm %s2646_s3, 4096 }
 0x1c4   :  { %p1955_p13 = scmp.ne.s32.totalorder %s2646_s3, %s1954_s15  ;;  %p1958_p0 = scmp.lt.u32.totalorder %s1954_s15, %s2646_s3 }
 0x1c6   :  { %p1960_p1 = pnand %p1958_p0, %p1955_p13 }
 0x1c8   :  { %1963 = shalt.err (!%p1960_p1)
}
 0x1c9   :  { %1333 = dma.vmem_to_hbm [thread:$0]  %s1328_s11, 4096, %s2646_s3, [#allocation4], %s1969_s22, %s1969_s22, %s1970_s23  }
 0x1ca   :  { %1966 = dma.done.wait [#allocation4], 4096  }
 0x1cb   :  { %1967 = vsyncadd [#allocation4], 4294963200 }
 0x1cc   :  { %1337 = vsyncpa [#allocation3], 1 }
 0x1cd   :  { %1338 = vsyncpa [#allocation4], 1 }

// kernel: tpu_custom_call.1
= control target key start
LH: loop header
LB: loop body
LE: loop exit
PB: predicated region body
PF: predicated region fallthrough
CT: control target
= control target key end

     0   :  { %8 = vsyncpa [#allocation3], 0  ;;  %s2643_s0 = inlined_call_operand.hbm [shape: bf16[256,256], index: 0, kind: input, shape index: {}, may-alias: {0,3}]   ;;  %s2644_s1 = inlined_call_operand.vmem [shape: bf16[256,256], index: 1, kind: input, shape index: {}]   ;;  %s2645_s2 = inlined_call_operand.vmem [shape: f32[1,256], index: 2, kind: input, shape index: {}]   ;;  %s2646_s3 = inlined_call_operand.hbm [shape: bf16[256,256], index: 3, kind: output, shape index: {}, may-alias: {0,3}]  }
   0x1   :  { %9 = vsyncpa [#allocation4], 0  ;;  %s1968_s12 = smov [#allocation2]   ;;  %s1920_s16 = scalar_lea.hbm %s2643_s0, 4096 }
   0x2   :  { %s15_s13 = sshll.u32 %s1968_s12, 4  ;;  %p1921_p0 = scmp.ne.s32.totalorder %s2643_s0, %s1920_s16  ;;  %s16_s13 = int_to_ptr.vmem [resolvable:$true] %s15_s13 }
   0x3   :  { %p1924_p1 = scmp.lt.u32.totalorder %s1920_s16, %s2643_s0 }
   0x5   :  { %p1926_p2 = pnand %p1924_p1, %p1921_p0 }
   0x7   :  { %1929 = shalt.err (!%p1926_p2)
}
   0x8   :  { %s1930_s21 = scalar_lea.vmem %s16_s13, 4096  ;;  %p1935_p4 = scmp.lt.s32.totalorder %s16_s13, %s16_s13 }
   0x9   :  { %p1931_p3 = scmp.ne.s32.totalorder %s16_s13, %s1930_s21  ;;  %p1936_p5 = scmp.lt.s32.totalorder %s1930_s21, %s1930_s21 }
   0xb   :  { %p1937_p6 = por %p1936_p5, %p1935_p4 }
   0xd   :  { %p1938_p7 = pnand %p1937_p6, %p1931_p3 }
   0xf   :  { %1941 = shalt.err (!%p1938_p7)
}
  0x10   :  { %s1969_s22 = smov 128   ;;  %s1970_s23 = smov 8  }
  0x11   :  { %21 = dma.hbm_to_vmem [thread:$0]  %s2643_s0, 4096, %s16_s13, [#allocation3], %s1969_s22, %s1969_s22, %s1970_s23  }
  0x12   :  { %1964 = dma.done.wait [#allocation3], 4096  }
  0x13   :  { %1965 = vsyncadd [#allocation3], 4294963200  ;;  %v1567_v0 = vld [vmem:[%s2644_s1 + $0x4] ss:$8 sps:$4 sm:$0xff]   ;;  %v1569_v1 = vld [vmem:[%s2644_s1] ss:$8 sps:$4 sm:$0xff]  }
  0x14   :  { %425 = vmatprep.subr.bf16.mxu0 %v1567_v0  ;;  %1531 = vmatprep.subr.bf16.mxu1 %v1567_v0  ;;  %v1570_v2 = vld [vmem:[%s2644_s1 + $0x14] ss:$8 sps:$4 sm:$0xff]   ;;  %v1572_v3 = vld [vmem:[%s2644_s1 + $0x10] ss:$8 sps:$4 sm:$0xff]   ;;  %v1573_v4 = vld [vmem:[%s2644_s1 + $0x24] ss:$8 sps:$4 sm:$0xff]  }
  0x15   :  { %426 = vmatpush1.bf16.msra.mxu0 %v1569_v1  ;;  %1547 = vmatpush1.bf16.msra.mxu1 %v1569_v1  ;;  %v1575_v5 = vld [vmem:[%s2644_s1 + $0x20] ss:$8 sps:$4 sm:$0xff]   ;;  %v1576_v6 = vld [vmem:[%s2644_s1 + $0x34] ss:$8 sps:$4 sm:$0xff]   ;;  %v1578_v7 = vld [vmem:[%s2644_s1 + $0x30] ss:$8 sps:$4 sm:$0xff]  }
  0x16   :  { %427 = vmatprep.subr.bf16.mxu0 %v1570_v2  ;;  %1532 = vmatprep.subr.bf16.mxu1 %v1570_v2  ;;  %v1579_v8 = vld [vmem:[%s2644_s1 + $0x44] ss:$8 sps:$4 sm:$0xff]   ;;  %v1581_v9 = vld [vmem:[%s2644_s1 + $0x40] ss:$8 sps:$4 sm:$0xff]   ;;  %v1582_v10 = vld [vmem:[%s2644_s1 + $0x54] ss:$8 sps:$4 sm:$0xff]  }
  0x17   :  { %v1584_v11 = vld [vmem:[%s2644_s1 + $0x50] ss:$8 sps:$4 sm:$0xff]   ;;  %v1585_v12 = vld [vmem:[%s2644_s1 + $0x64] ss:$8 sps:$4 sm:$0xff]   ;;  %v1587_v18 = vld [vmem:[%s2644_s1 + $0x60] ss:$8 sps:$4 sm:$0xff]  }
  0x18   :  { %v2046_v13 = vld [vmem:[#allocation2] sm:$0xff]  ;;  %v2048_v14 = vld [vmem:[#allocation2 + $0x8] sm:$0xff]  ;;  %v1588_v20 = vld [vmem:[%s2644_s1 + $0x74] ss:$8 sps:$4 sm:$0xff]  }
  0x19   :  { %428 = vmatpush1.bf16.msra.mxu0 %v1572_v3  ;;  %1548 = vmatpush1.bf16.msra.mxu1 %v1572_v3  ;;  %v1340_v15 = vcombine.high %v2046_v13, %v2048_v14  ;;  %v2052_v16 = vld [vmem:[#allocation2 + $0x80] sm:$0xff]  ;;  %v2054_v17 = vld [vmem:[#allocation2 + $0x88] sm:$0xff]  ;;  %v1590_v21 = vld [vmem:[%s2644_s1 + $0x70] ss:$8 sps:$4 sm:$0xff]   ;;  %v1339_v42 = vcombine.low %v2046_v13, %v2048_v14 }
  0x1a   :  { %429 = vmatprep.subr.bf16.mxu0 %v1573_v4  ;;  %1533 = vmatprep.subr.bf16.mxu1 %v1573_v4  ;;  %v1356_v19 = vcombine.high %v2052_v16, %v2054_v17  ;;  %v1591_v22 = vld [vmem:[%s2644_s1 + $0x84] ss:$8 sps:$4 sm:$0xff]   ;;  %v1593_v23 = vld [vmem:[%s2644_s1 + $0x80] ss:$8 sps:$4 sm:$0xff]   ;;  %v1594_v24 = vld [vmem:[%s2644_s1 + $0x94] ss:$8 sps:$4 sm:$0xff]   ;;  %v1355_v43 = vcombine.low %v2052_v16, %v2054_v17 }
  0x1b   :  { %457 = vmatprep.mubr.bf16.mxu0 %v1340_v15  ;;  %v1596_v25 = vld [vmem:[%s2644_s1 + $0x90] ss:$8 sps:$4 sm:$0xff]   ;;  %v1597_v26 = vld [vmem:[%s2644_s1 + $0xa4] ss:$8 sps:$4 sm:$0xff]   ;;  %v1599_v27 = vld [vmem:[%s2644_s1 + $0xa0] ss:$8 sps:$4 sm:$0xff]  }
  0x1c   :  { %537 = vmatprep.mubr.bf16.mxu1 %v1356_v19  ;;  %v1600_v28 = vld [vmem:[%s2644_s1 + $0xb4] ss:$8 sps:$4 sm:$0xff]   ;;  %v1602_v29 = vld [vmem:[%s2644_s1 + $0xb0] ss:$8 sps:$4 sm:$0xff]   ;;  %v1603_v30 = vld [vmem:[%s2644_s1 + $0xc4] ss:$8 sps:$4 sm:$0xff]  }
  0x1d   :  { %430 = vmatpush1.bf16.msra.mxu0 %v1575_v5  ;;  %1549 = vmatpush1.bf16.msra.mxu1 %v1575_v5  ;;  %v1605_v31 = vld [vmem:[%s2644_s1 + $0xc0] ss:$8 sps:$4 sm:$0xff]   ;;  %v1606_v32 = vld [vmem:[%s2644_s1 + $0xd4] ss:$8 sps:$4 sm:$0xff]   ;;  %v1608_v33 = vld [vmem:[%s2644_s1 + $0xd0] ss:$8 sps:$4 sm:$0xff]  }
  0x1e   :  { %431 = vmatprep.subr.bf16.mxu0 %v1576_v6  ;;  %1534 = vmatprep.subr.bf16.mxu1 %v1576_v6  ;;  %v1609_v34 = vld [vmem:[%s2644_s1 + $0xe4] ss:$8 sps:$4 sm:$0xff]   ;;  %v1611_v35 = vld [vmem:[%s2644_s1 + $0xe0] ss:$8 sps:$4 sm:$0xff]   ;;  %v1612_v36 = vld [vmem:[%s2644_s1 + $0xf4] ss:$8 sps:$4 sm:$0xff]  }
  0x1f   :  { %v1614_v37 = vld [vmem:[%s2644_s1 + $0xf0] ss:$8 sps:$4 sm:$0xff]   ;;  %v2131_v46 = vld [vmem:[#allocation2 + $0x20] sm:$0xff]  ;;  %v2133_v47 = vld [vmem:[#allocation2 + $0x28] sm:$0xff] }
  0x20   :  { %v2115_v38 = vld [vmem:[#allocation2 + $0x10] sm:$0xff]  ;;  %v2117_v39 = vld [vmem:[#allocation2 + $0x18] sm:$0xff]  ;;  %2653 = vst [vmem:[#allocation8_spill] sm:$0xff] %v2133_v47  ;;  %v2135_v48 = vld [vmem:[#allocation2 + $0xa0] sm:$0xff]  ;;  %v1344_v52 = vcombine.high %v2131_v46, %v2133_v47  ;;  %v1343_v58 = vcombine.low %v2131_v46, %v2133_v47 }
  0x21   :  { %432 = vmatpush1.bf16.msra.mxu0 %v1578_v7  ;;  %1550 = vmatpush1.bf16.msra.mxu1 %v1578_v7  ;;  %v2119_v40 = vld [vmem:[#allocation2 + $0x90] sm:$0xff]  ;;  %v2121_v41 = vld [vmem:[#allocation2 + $0x98] sm:$0xff]  ;;  %v1342_v44 = vcombine.high %v2115_v38, %v2117_v39  ;;  %2654 = vst [vmem:[#allocation9_spill] sm:$0xff] %v2135_v48  ;;  %v2137_v49 = vld [vmem:[#allocation2 + $0xa8] sm:$0xff]  ;;  %v1341_v50 = vcombine.low %v2115_v38, %v2117_v39 }
  0x22   :  { %433 = vmatprep.subr.bf16.mxu0 %v1579_v8  ;;  %1535 = vmatprep.subr.bf16.mxu1 %v1579_v8  ;;  %v1358_v45 = vcombine.high %v2119_v40, %v2121_v41  ;;  %2655 = vst [vmem:[#allocation10_spill] sm:$0xff] %v2137_v49  ;;  %v1357_v51 = vcombine.low %v2119_v40, %v2121_v41  ;;  %v2147_v54 = vld [vmem:[#allocation2 + $0x30] sm:$0xff]  ;;  %v2149_v55 = vld [vmem:[#allocation2 + $0x38] sm:$0xff]  ;;  %v37_v62 = vld [vmem:[#allocation2 + $0x40] sm:$0xff] }
  0x23   :  { %v1360_v53 = vcombine.high %v2135_v48, %v2137_v49  ;;  %2656 = vst [vmem:[#allocation11_spill] sm:$0xff] %v2147_v54  ;;  %2657 = vst [vmem:[#allocation12_spill] sm:$0xff] %v2149_v55  ;;  %v2151_v56 = vld [vmem:[#allocation2 + $0xb0] sm:$0xff]  ;;  %v52_v57 = vld [vmem:[#allocation2 + $0xb8] sm:$0xff]  ;;  %v1359_v59 = vcombine.low %v2135_v48, %v2137_v49  ;;  %v1346_v60 = vcombine.high %v2147_v54, %v2149_v55 }
  0x24   :  { %2658 = vst [vmem:[#allocation13_spill] sm:$0xff] %v2151_v56  ;;  %v1362_v61 = vcombine.high %v2151_v56, %v52_v57  ;;  %v38_v63 = vld [vmem:[#allocation2 + $0x48] sm:$0xff]  ;;  %v53_v0 = vld [vmem:[#allocation2 + $0xc0] sm:$0xff]  ;;  %v1345_v2 = vcombine.low %v2147_v54, %v2149_v55  ;;  %v1361_v3 = vcombine.low %v2151_v56, %v52_v57  ;;  %v39_v6 = vld [vmem:[#allocation2 + $0x50] sm:$0xff] }
  0x25   :  { %434 = vmatpush1.bf16.msra.mxu0 %v1581_v9  ;;  %1551 = vmatpush1.bf16.msra.mxu1 %v1581_v9  ;;  %v54_v1 = vld [vmem:[#allocation2 + $0xc8] sm:$0xff]  ;;  %v1348_v4 = vcombine.high %v37_v62, %v38_v63  ;;  %v40_v7 = vld [vmem:[#allocation2 + $0x58] sm:$0xff]  ;;  %v55_v8 = vld [vmem:[#allocation2 + $0xd0] sm:$0xff] }
  0x26   :  { %435 = vmatprep.subr.bf16.mxu0 %v1582_v10  ;;  %1536 = vmatprep.subr.bf16.mxu1 %v1582_v10  ;;  %v1364_v5 = vcombine.high %v53_v0, %v54_v1  ;;  %v56_v9 = vld [vmem:[#allocation2 + $0xd8] sm:$0xff]  ;;  %v1347_v10 = vcombine.low %v37_v62, %v38_v63  ;;  %v42_v19 = vld [vmem:[#allocation2 + $0x68] sm:$0xff] }
  0x27   :  { %v1366_v15 = vcombine.high %v55_v8, %v56_v9 }
  0x29   :  { %436 = vmatpush1.bf16.msra.mxu0 %v1584_v11  ;;  %1552 = vmatpush1.bf16.msra.mxu1 %v1584_v11  ;;  %v1363_v11 = vcombine.low %v53_v0, %v54_v1 }
  0x2a   :  { %437 = vmatprep.subr.bf16.mxu0 %v1585_v12  ;;  %1537 = vmatprep.subr.bf16.mxu1 %v1585_v12  ;;  %v1350_v12 = vcombine.high %v39_v6, %v40_v7 }
  0x2d   :  { %438 = vmatpush1.bf16.msra.mxu0 %v1587_v18  ;;  %1553 = vmatpush1.bf16.msra.mxu1 %v1587_v18  ;;  %v41_v18 = vld [vmem:[#allocation2 + $0x60] sm:$0xff] }
  0x2e   :  { %439 = vmatprep.subr.bf16.mxu0 %v1588_v20  ;;  %1538 = vmatprep.subr.bf16.mxu1 %v1588_v20  ;;  %v57_v20 = vld [vmem:[#allocation2 + $0xe0] sm:$0xff] }
  0x31   :  { %440 = vmatpush1.bf16.msra.mxu0 %v1590_v21  ;;  %1554 = vmatpush1.bf16.msra.mxu1 %v1590_v21  ;;  %v58_v21 = vld [vmem:[#allocation2 + $0xe8] sm:$0xff] }
  0x32   :  { %441 = vmatprep.subr.bf16.mxu0 %v1591_v22  ;;  %1539 = vmatprep.subr.bf16.mxu1 %v1591_v22  ;;  %v1349_v22 = vcombine.low %v39_v6, %v40_v7 }
  0x35   :  { %442 = vmatpush1.bf16.msra.mxu0 %v1593_v23  ;;  %1555 = vmatpush1.bf16.msra.mxu1 %v1593_v23  ;;  %v1365_v23 = vcombine.low %v55_v8, %v56_v9 }
  0x36   :  { %443 = vmatprep.subr.bf16.mxu0 %v1594_v24  ;;  %1540 = vmatprep.subr.bf16.mxu1 %v1594_v24  ;;  %v1352_v24 = vcombine.high %v41_v18, %v42_v19 }
  0x39   :  { %444 = vmatpush1.bf16.msra.mxu0 %v1596_v25  ;;  %1556 = vmatpush1.bf16.msra.mxu1 %v1596_v25  ;;  %v1368_v25 = vcombine.high %v57_v20, %v58_v21 }
  0x3a   :  { %445 = vmatprep.subr.bf16.mxu0 %v1597_v26  ;;  %1541 = vmatprep.subr.bf16.mxu1 %v1597_v26  ;;  %v43_v26 = vld [vmem:[#allocation2 + $0x70] sm:$0xff] }
  0x3d   :  { %446 = vmatpush1.bf16.msra.mxu0 %v1599_v27  ;;  %1557 = vmatpush1.bf16.msra.mxu1 %v1599_v27  ;;  %v44_v27 = vld [vmem:[#allocation2 + $0x78] sm:$0xff] }
  0x3e   :  { %447 = vmatprep.subr.bf16.mxu0 %v1600_v28  ;;  %1542 = vmatprep.subr.bf16.mxu1 %v1600_v28  ;;  %v59_v28 = vld [vmem:[#allocation2 + $0xf0] sm:$0xff] }
  0x41   :  { %448 = vmatpush1.bf16.msra.mxu0 %v1602_v29  ;;  %1558 = vmatpush1.bf16.msra.mxu1 %v1602_v29  ;;  %v60_v29 = vld [vmem:[#allocation2 + $0xf8] sm:$0xff] }
  0x42   :  { %449 = vmatprep.subr.bf16.mxu0 %v1603_v30  ;;  %1543 = vmatprep.subr.bf16.mxu1 %v1603_v30  ;;  %v1351_v30 = vcombine.low %v41_v18, %v42_v19 }
  0x45   :  { %450 = vmatpush1.bf16.msra.mxu0 %v1605_v31  ;;  %1559 = vmatpush1.bf16.msra.mxu1 %v1605_v31  ;;  %v1367_v31 = vcombine.low %v57_v20, %v58_v21 }
  0x46   :  { %451 = vmatprep.subr.bf16.mxu0 %v1606_v32  ;;  %1544 = vmatprep.subr.bf16.mxu1 %v1606_v32  ;;  %v1354_v32 = vcombine.high %v43_v26, %v44_v27 }
  0x49   :  { %452 = vmatpush1.bf16.msra.mxu0 %v1608_v33  ;;  %1560 = vmatpush1.bf16.msra.mxu1 %v1608_v33  ;;  %v1370_v33 = vcombine.high %v59_v28, %v60_v29 }
  0x4a   :  { %453 = vmatprep.subr.bf16.mxu0 %v1609_v34  ;;  %1545 = vmatprep.subr.bf16.mxu1 %v1609_v34  ;;  %v1353_v34 = vcombine.low %v43_v26, %v44_v27 }
  0x4d   :  { %454 = vmatpush1.bf16.msra.mxu0 %v1611_v35  ;;  %1561 = vmatpush1.bf16.msra.mxu1 %v1611_v35  ;;  %v1369_v35 = vcombine.low %v59_v28, %v60_v29 }
  0x4e   :  { %455 = vmatprep.subr.bf16.mxu0 %v1612_v36  ;;  %1546 = vmatprep.subr.bf16.mxu1 %v1612_v36  ;;  %v95_v36 = vlaneseq }
  0x51   :  { %456 = vmatpush1.bf16.msra.mxu0 %v1614_v37  ;;  %1562 = vmatpush1.bf16.msra.mxu1 %v1614_v37  ;;  %v96_v37 = vshrl.u32 %v95_v36, 7 }
  0x54   :  { %458 = vmatmul.mubr.bf16.vlgmr.msra.gmra.mrb[0].mxu0 %v1339_v42  ;;  %538 = vmatmul.mubr.bf16.vlgmr.msra.gmra.mrb[0].mxu1 %v1355_v43  ;;  %v97_v42 = vsub.s32 0, %v96_v37  ;;  %v93_v43 = vld [vmem:[%s2645_s2] sm:$0x3]  ;;  %s1971_s2 = smov [#allocation5]  }
  0x55   :  { %467 = vmatprep.mubr.bf16.mxu0 %v1342_v44  ;;  %547 = vmatprep.mubr.bf16.mxu1 %v1358_v45  ;;  %v101_v44 = vsub.s32 1, %v96_v37  ;;  %s1327_s11 = sshll.u32 %s1971_s2, 4  ;;  %s1328_s11 = int_to_ptr.vmem [resolvable:$true] %s1327_s11 }
  0x56   :  { %v2166_v45 = vrot.slane %v93_v43, %v97_v42  ;;  %s1942_s12 = scalar_lea.vmem %s1328_s11, 4096  ;;  %p1947_p9 = scmp.lt.s32.totalorder %s1328_s11, %s1328_s11 }
  0x57   :  { %p1943_p8 = scmp.ne.s32.totalorder %s1328_s11, %s1942_s12  ;;  %p1948_p10 = scmp.lt.s32.totalorder %s1942_s12, %s1942_s12 }
  0x59   :  { %p1949_p11 = por %p1948_p10, %p1947_p9 }
  0x5b   :  { %p1950_p12 = pnand %p1949_p11, %p1943_p8 }
  0x5c   :  { %468 = vmatmul.mubr.bf16.gmra.mrb[4].mxu0 %v1341_v50  ;;  %548 = vmatmul.mubr.bf16.gmra.mrb[4].mxu1 %v1357_v51  ;;  %v2168_v50 = vrot.slane %v93_v43, %v101_v44 }
  0x5d   :  { %477 = vmatprep.mubr.bf16.mxu0 %v1344_v52  ;;  %557 = vmatprep.mubr.bf16.mxu1 %v1360_v53 }
  0x64   :  { %478 = vmatmul.mubr.bf16.gmra.mrb[8].mxu0 %v1343_v58  ;;  %558 = vmatmul.mubr.bf16.gmra.mrb[8].mxu1 %v1359_v59 }
  0x65   :  { %487 = vmatprep.mubr.bf16.mxu0 %v1346_v60  ;;  %567 = vmatprep.mubr.bf16.mxu1 %v1362_v61 }
  0x6c   :  { %488 = vmatmul.mubr.bf16.gmra.mrb[12].mxu0 %v1345_v2  ;;  %568 = vmatmul.mubr.bf16.gmra.mrb[12].mxu1 %v1361_v3 }
  0x6d   :  { %497 = vmatprep.mubr.bf16.mxu0 %v1348_v4  ;;  %577 = vmatprep.mubr.bf16.mxu1 %v1364_v5 }
  0x74   :  { %498 = vmatmul.mubr.bf16.gmra.mrb[16].mxu0 %v1347_v10  ;;  %578 = vmatmul.mubr.bf16.gmra.mrb[16].mxu1 %v1363_v11 }
  0x75   :  { %507 = vmatprep.mubr.bf16.mxu0 %v1350_v12  ;;  %587 = vmatprep.mubr.bf16.mxu1 %v1366_v15 }
  0x7c   :  { %508 = vmatmul.mubr.bf16.gmra.mrb[20].mxu0 %v1349_v22  ;;  %588 = vmatmul.mubr.bf16.gmra.mrb[20].mxu1 %v1365_v23 }
  0x7d   :  { %517 = vmatprep.mubr.bf16.mxu0 %v1352_v24  ;;  %597 = vmatprep.mubr.bf16.mxu1 %v1368_v25 }
  0x84   :  { %518 = vmatmul.mubr.bf16.gmra.mrb[24].mxu0 %v1351_v30  ;;  %598 = vmatmul.mubr.bf16.gmra.mrb[24].mxu1 %v1367_v31 }
  0x85   :  { %527 = vmatprep.mubr.bf16.mxu0 %v1354_v32  ;;  %607 = vmatprep.mubr.bf16.mxu1 %v1370_v33 }
  0x8c   :  { %528 = vmatmul.mubr.bf16.gmra.mrb[28].mxu0 %v1353_v34  ;;  %608 = vmatmul.mubr.bf16.gmra.mrb[28].mxu1 %v1369_v35 }
 0x127   :  { %v459_v51 = vpop.f32.mrb[0].mxu0  ;;  %v539_v52 = vpop.f32.mrb[0].mxu1 }
 0x128   :  { %v2171_v53 = vadd.f32 %v459_v51, %v2166_v45  ;;  %v2174_v57 = vadd.f32 %v539_v52, %v2166_v45  ;;  %v461_v58 = vpop.f32.mrb[1].mxu0  ;;  %v541_v59 = vpop.f32.mrb[1].mxu1 }
 0x129   :  { %v2177_v60 = vadd.f32 %v461_v58, %v2168_v50  ;;  %v2180_v61 = vadd.f32 %v541_v59, %v2168_v50  ;;  %v463_v62 = vpop.f32.mrb[2].mxu0  ;;  %v543_v63 = vpop.f32.mrb[2].mxu1 }
 0x12a   :  { %v1403_v0 = vmul.f32 -1.442695, %v2171_v53  ;;  %v1435_v1 = vmul.f32 -1.442695, %v2174_v57  ;;  %v2185_v2 = vadd.f32 %v463_v62, %v2166_v45  ;;  %v2188_v3 = vadd.f32 %v543_v63, %v2166_v45  ;;  %v465_v4 = vpop.f32.mrb[3].mxu0  ;;  %v545_v5 = vpop.f32.mrb[3].mxu1 }
 0x12b   :  { %v1404_v6 = vmul.f32 -1.442695, %v2177_v60  ;;  %v1436_v7 = vmul.f32 -1.442695, %v2180_v61  ;;  %v2193_v8 = vadd.f32 %v465_v4, %v2168_v50  ;;  %v2196_v9 = vadd.f32 %v545_v5, %v2168_v50 }
 0x12c   :  { %1647 = vpow2.f32 %v1403_v0  ;;  %v1405_v10 = vmul.f32 -1.442695, %v2185_v2  ;;  %v1437_v11 = vmul.f32 -1.442695, %v2188_v3 }
 0x12d   :  { %1649 = vpow2.f32 %v1435_v1  ;;  %v1406_v12 = vmul.f32 -1.442695, %v2193_v8  ;;  %v1438_v15 = vmul.f32 -1.442695, %v2196_v9 }
 0x12e   :  { %1651 = vpow2.f32 %v1404_v6 }
 0x12f   :  { %1653 = vpow2.f32 %v1436_v7  ;;  %v469_v18 = vpop.f32.mrb[4].mxu0  ;;  %v549_v19 = vpop.f32.mrb[4].mxu1 }
 0x130   :  { %1655 = vpow2.f32 %v1405_v10  ;;  %v2203_v20 = vadd.f32 %v469_v18, %v2166_v45  ;;  %v2206_v21 = vadd.f32 %v549_v19, %v2166_v45  ;;  %v471_v22 = vpop.f32.mrb[5].mxu0  ;;  %v551_v23 = vpop.f32.mrb[5].mxu1 }
 0x131   :  { %1657 = vpow2.f32 %v1437_v11  ;;  %v2209_v24 = vadd.f32 %v471_v22, %v2168_v50  ;;  %v2212_v25 = vadd.f32 %v551_v23, %v2168_v50  ;;  %v473_v26 = vpop.f32.mrb[6].mxu0  ;;  %v553_v27 = vpop.f32.mrb[6].mxu1 }
 0x132   :  { %1659 = vpow2.f32 %v1406_v12  ;;  %v1407_v28 = vmul.f32 -1.442695, %v2203_v20  ;;  %v1439_v29 = vmul.f32 -1.442695, %v2206_v21  ;;  %v2217_v30 = vadd.f32 %v473_v26, %v2166_v45  ;;  %v475_v31 = vpop.f32.mrb[7].mxu0  ;;  %v555_v32 = vpop.f32.mrb[7].mxu1 }
 0x133   :  { %1661 = vpow2.f32 %v1438_v15  ;;  %v1408_v33 = vmul.f32 -1.442695, %v2209_v24  ;;  %v1440_v34 = vmul.f32 -1.442695, %v2212_v25  ;;  %v2225_v18 = vadd.f32 %v553_v27, %v2166_v45 }
 0x134   :  { %1663 = vpow2.f32 %v1407_v28  ;;  %v1409_v35 = vmul.f32 -1.442695, %v2217_v30  ;;  %v2228_v28 = vadd.f32 %v475_v31, %v2168_v50 }
 0x135   :  { %1665 = vpow2.f32 %v1439_v29 }
 0x136   :  { %v1648_v36 = vpop.eup %1647  ;;  %1667 = vpow2.f32 %v1408_v33 }
 0x137   :  { %v1650_v37 = vpop.eup %1649  ;;  %v810_v42 = vadd.f32 1.0, %v1648_v36  ;;  %1669 = vpow2.f32 %v1440_v34  ;;  %v479_v43 = vpop.f32.mrb[8].mxu0  ;;  %v2231_v34 = vadd.f32 %v555_v32, %v2168_v50 }
 0x138   :  { %v559_v44 = vpop.f32.mrb[8].mxu1  ;;  %v1652_v51 = vpop.eup %1651  ;;  %v842_v52 = vadd.f32 1.0, %v1650_v37  ;;  %1671 = vpow2.f32 %v1409_v35  ;;  %v1441_v37 = vmul.f32 -1.442695, %v2225_v18 }
 0x139   :  { %v481_v58 = vpop.f32.mrb[9].mxu0  ;;  %v561_v59 = vpop.f32.mrb[9].mxu1  ;;  %1673 = vrcp.f32 %v810_v42  ;;  %v811_v63 = vadd.f32 1.0, %v1652_v51  ;;  %v2235_v42 = vadd.f32 %v479_v43, %v2166_v45 }
 0x13a   :  { %v1654_v62 = vpop.eup %1653  ;;  %v483_v0 = vpop.f32.mrb[10].mxu0  ;;  %1675 = vrcp.f32 %v842_v52  ;;  %v2243_v32 = vadd.f32 %v481_v58, %v2168_v50 }
 0x13b   :  { %v563_v1 = vpop.f32.mrb[10].mxu1  ;;  %v1656_v4 = vpop.eup %1655  ;;  %v843_v5 = vadd.f32 1.0, %v1654_v62  ;;  %1677 = vrcp.f32 %v811_v63  ;;  %v2240_v63 = vadd.f32 %v559_v44, %v2166_v45 }
 0x13c   :  { %v485_v6 = vpop.f32.mrb[11].mxu0  ;;  %v1658_v7 = vpop.eup %1657  ;;  %v812_v10 = vadd.f32 1.0, %v1656_v4 }
 0x13d   :  { %v2222_v11 = vpop.f32.mrb[11].mxu1  ;;  %v1660_v12 = vpop.eup %1659  ;;  %1679 = vrcp.f32 %v843_v5  ;;  %v844_v15 = vadd.f32 1.0, %v1658_v7 }
 0x13e   :  { %v1662_v19 = vpop.eup %1661  ;;  %1681 = vrcp.f32 %v812_v10  ;;  %v813_v22 = vadd.f32 1.0, %v1660_v12  ;;  %v1410_v10 = vmul.f32 -1.442695, %v2228_v28  ;;  %v2251_v12 = vadd.f32 %v561_v59, %v2168_v50 }
 0x13f   :  { %v1664_v23 = vpop.eup %1663  ;;  %1683 = vrcp.f32 %v844_v15  ;;  %v845_v26 = vadd.f32 1.0, %v1662_v19  ;;  %v489_v35 = vpop.f32.mrb[12].mxu0  ;;  %v1411_v59 = vmul.f32 -1.442695, %v2235_v42 }
 0x140   :  { %v1666_v29 = vpop.eup %1665  ;;  %1685 = vrcp.f32 %v813_v22  ;;  %v814_v33 = vadd.f32 1.0, %v1664_v23  ;;  %v569_v51 = vpop.f32.mrb[12].mxu1  ;;  %v1442_v22 = vmul.f32 -1.442695, %v2231_v34  ;;  %v2259_v23 = vadd.f32 %v483_v0, %v2166_v45 }
 0x141   :  { %v1668_v36 = vpop.eup %1667  ;;  %1687 = vrcp.f32 %v845_v26  ;;  %v846_v27 = vadd.f32 1.0, %v1666_v29  ;;  %v2237_v52 = vpop.f32.mrb[13].mxu0  ;;  %v1412_v0 = vmul.f32 -1.442695, %v2243_v32  ;;  %v2294_v49 = vadd.f32 %v489_v35, %v2166_v45 }
 0x142   :  { %v1670_v31 = vpop.eup %1669  ;;  %1689 = vrcp.f32 %v814_v33  ;;  %v815_v62 = vadd.f32 1.0, %v1668_v36  ;;  %v2245_v4 = vpop.f32.mrb[13].mxu1  ;;  %v2266_v36 = vadd.f32 %v563_v1, %v2166_v45 }
 0x143   :  { %v2247_v5 = vpop.f32.mrb[14].mxu0  ;;  %v1672_v7 = vpop.eup %1671  ;;  %1691 = vrcp.f32 %v846_v27  ;;  %v847_v43 = vadd.f32 1.0, %v1670_v31 }
 0x144   :  { %v2253_v15 = vpop.f32.mrb[14].mxu1  ;;  %v2255_v19 = vpop.f32.mrb[15].mxu0  ;;  %1693 = vrcp.f32 %v815_v62  ;;  %v816_v58 = vadd.f32 1.0, %v1672_v7  ;;  %v1443_v62 = vmul.f32 -1.442695, %v2240_v63 }
 0x145   :  { %v1674_v44 = vpop.eup %1673  ;;  %v2261_v26 = vpop.f32.mrb[15].mxu1  ;;  %1695 = vrcp.f32 %v847_v43  ;;  %v2274_v43 = vadd.f32 %v485_v6, %v2168_v50  ;;  %v1445_v6 = vmul.f32 -1.442695, %v2266_v36 }
 0x146   :  { %v1676_v29 = vpop.eup %1675  ;;  %v1002_v33 = vmul.f32 %v1674_v44, %v2171_v53  ;;  %1697 = vrcp.f32 %v816_v58  ;;  %v1444_v53 = vmul.f32 -1.442695, %v2251_v12  ;;  %v2280_v58 = vadd.f32 %v2222_v11, %v2168_v50 }
 0x147   :  { %v1678_v27 = vpop.eup %1677  ;;  %v1034_v31 = vmul.f32 %v1676_v29, %v2174_v57  ;;  %1699 = vpow2.f32 %v1441_v37  ;;  %v1413_v57 = vmul.f32 -1.442695, %v2259_v23  ;;  %v2282_v29 = vpop.f32.mrb[16].mxu0 }
 0x148   :  { %v1680_v7 = vpop.eup %1679  ;;  %v1003_v55 = vmul.f32 %v1678_v27, %v2177_v60  ;;  %1701 = vpow2.f32 %v1410_v10  ;;  %v2284_v56 = vpop.f32.mrb[16].mxu1 }
 0x149   :  { %v1682_v44 = vpop.eup %1681  ;;  %v1035_v1 = vmul.f32 %v1680_v7, %v2180_v61  ;;  %1703 = vpow2.f32 %v1442_v22  ;;  %v2288_v54 = vpop.f32.mrb[17].mxu0 }
 0x14a   :  { %v1684_v60 = vpop.eup %1683  ;;  %v1499_v37 = vpack.c.bf16 %v1003_v55, %v1002_v33  ;;  %v1004_v27 = vmul.f32 %v1682_v44, %v2185_v2  ;;  %v2290_v61 = vpop.f32.mrb[17].mxu1  ;;  %1705 = vpow2.f32 %v1411_v59  ;;  %v2303_v44 = vadd.f32 %v569_v51, %v2166_v45 }
 0x14b   :  { %v1686_v10 = vpop.eup %1685  ;;  %v1515_v7 = vpack.c.bf16 %v1035_v1, %v1034_v31  ;;  %v1036_v11 = vmul.f32 %v1684_v60, %v2188_v3  ;;  %v2296_v47 = vpop.f32.mrb[18].mxu0  ;;  %1707 = vpow2.f32 %v1443_v62  ;;  %v1414_v60 = vmul.f32 -1.442695, %v2274_v43 }
 0x14c   :  { %v2298_v55 = vpop.f32.mrb[18].mxu1  ;;  %v1688_v2 = vpop.eup %1687  ;;  %v1258_v22 = vadd.bf16 %v1499_v37, %v2046_v13  ;;  %v1005_v33 = vmul.f32 %v1686_v10, %v2193_v8  ;;  %1709 = vpow2.f32 %v1412_v0  ;;  %v1446_v51 = vmul.f32 -1.442695, %v2280_v58 }
 0x14d   :  { %v2305_v31 = vpop.f32.mrb[19].mxu0  ;;  %v2307_v3 = vpop.f32.mrb[19].mxu1  ;;  %v1274_v35 = vadd.bf16 %v1515_v7, %v2052_v16  ;;  %v1037_v1 = vmul.f32 %v1688_v2, %v2196_v9  ;;  %1711 = vpow2.f32 %v1444_v53  ;;  %v1415_v16 = vmul.f32 -1.442695, %v2294_v49 }
 0x14e   :  { %v1690_v59 = vpop.eup %1689  ;;  %1290 = vst [vmem:[#allocation5] sm:$0xff] %v1258_v22  ;;  %v1500_v13 = vpack.c.bf16 %v1005_v33, %v1004_v27  ;;  %1713 = vpow2.f32 %v1413_v57  ;;  %v1447_v27 = vmul.f32 -1.442695, %v2303_v44 }
 0x14f   :  { %v1692_v48 = vpop.eup %1691  ;;  %v1006_v8 = vmul.f32 %v1690_v59, %v2203_v20  ;;  %1306 = vst [vmem:[#allocation5 + $0x80] sm:$0xff] %v1274_v35  ;;  %v1516_v37 = vpack.c.bf16 %v1037_v1, %v1036_v11  ;;  %1715 = vpow2.f32 %v1445_v6  ;;  %v2323_v11 = vpop.f32.mrb[20].mxu0 }
 0x150   :  { %v1694_v62 = vpop.eup %1693  ;;  %v1038_v10 = vmul.f32 %v1692_v48, %v2206_v21  ;;  %v1259_v0 = vadd.bf16 %v1500_v13, %v2048_v14  ;;  %1717 = vpow2.f32 %v1414_v60  ;;  %v2325_v48 = vpop.f32.mrb[20].mxu1 }
 0x151   :  { %v1696_v9 = vpop.eup %1695  ;;  %v1007_v7 = vmul.f32 %v1694_v62, %v2209_v24  ;;  %v1275_v53 = vadd.bf16 %v1516_v37, %v2054_v17  ;;  %1719 = vpow2.f32 %v1446_v51  ;;  %v2327_v14 = vpop.f32.mrb[21].mxu0 }
 0x152   :  { %v2319_v20 = vpop.eup %1697  ;;  %v1039_v2 = vmul.f32 %v1696_v9, %v2212_v25  ;;  %1291 = vst [vmem:[#allocation5 + $0x8] sm:$0xff] %v1259_v0  ;;  %v2329_v24 = vpop.f32.mrb[21].mxu1  ;;  %1721 = vpow2.f32 %v1415_v16  ;;  %v2343_v16 = vadd.f32 %v2237_v52, %v2168_v50  ;;  %v2347_v0 = vadd.f32 %v2245_v4, %v2168_v50 }
 0x153   :  { %v1700_v21 = vpop.eup %1699  ;;  %v1501_v57 = vpack.c.bf16 %v1007_v7, %v1006_v8  ;;  %1307 = vst [vmem:[#allocation5 + $0x88] sm:$0xff] %v1275_v53  ;;  %v2331_v17 = vpop.f32.mrb[22].mxu0  ;;  %1723 = vpow2.f32 %v1447_v27 }
 0x154   :  { %v1702_v6 = vpop.eup %1701  ;;  %v1517_v22 = vpack.c.bf16 %v1039_v2, %v1038_v10  ;;  %v848_v33 = vadd.f32 1.0, %v1700_v21  ;;  %v2333_v25 = vpop.f32.mrb[22].mxu1 }
 0x155   :  { %v1704_v59 = vpop.eup %1703  ;;  %v1260_v35 = vadd.bf16 %v1501_v57, %v2115_v38  ;;  %v817_v1 = vadd.f32 1.0, %v1702_v6  ;;  %v2336_v60 = vpop.f32.mrb[23].mxu0  ;;  %v1416_v57 = vmul.f32 -1.442695, %v2343_v16  ;;  %v2354_v6 = vadd.f32 %v2247_v5, %v2166_v45 }
 0x156   :  { %v2338_v13 = vpop.f32.mrb[23].mxu1  ;;  %v1706_v8 = vpop.eup %1705  ;;  %v1276_v51 = vadd.bf16 %v1517_v22, %v2119_v40  ;;  %1725 = vrcp.f32 %v848_v33  ;;  %v849_v62 = vadd.f32 1.0, %v1704_v59  ;;  %v2367_v5 = vadd.f32 %v2253_v15, %v2166_v45 }
 0x157   :  { %v1708_v37 = vpop.eup %1707  ;;  %1292 = vst [vmem:[#allocation5 + $0x10] sm:$0xff] %v1260_v35  ;;  %1727 = vrcp.f32 %v817_v1  ;;  %v818_v10 = vadd.f32 1.0, %v1706_v8  ;;  %v2349_v2 = vpop.f32.mrb[24].mxu0  ;;  %v1448_v35 = vmul.f32 -1.442695, %v2347_v0 }
 0x158   :  { %v1710_v38 = vpop.eup %1709  ;;  %1308 = vst [vmem:[#allocation5 + $0x90] sm:$0xff] %v1276_v51  ;;  %1729 = vrcp.f32 %v849_v62  ;;  %v850_v9 = vadd.f32 1.0, %v1708_v37  ;;  %v2356_v22 = vpop.f32.mrb[24].mxu1  ;;  %v2371_v37 = vadd.f32 %v2255_v19, %v2168_v50 }
 0x159   :  { %v1712_v7 = vpop.eup %1711  ;;  %1731 = vrcp.f32 %v818_v10  ;;  %v819_v40 = vadd.f32 1.0, %v1710_v38  ;;  %v2358_v4 = vpop.f32.mrb[25].mxu0 }
 0x15a   :  { %v1714_v27 = vpop.eup %1713  ;;  %1733 = vrcp.f32 %v850_v9  ;;  %v851_v53 = vadd.f32 1.0, %v1712_v7  ;;  %v2361_v1 = vpop.f32.mrb[25].mxu1 }
 0x15b   :  { %v1716_v21 = vpop.eup %1715  ;;  %1735 = vrcp.f32 %v819_v40  ;;  %v820_v52 = vadd.f32 1.0, %v1714_v27  ;;  %v2363_v8 = vpop.f32.mrb[26].mxu0  ;;  %v2379_v40 = vadd.f32 %v2261_v26, %v2168_v50  ;;  %v2383_v27 = vadd.f32 %v2282_v29, %v2166_v45 }
 0x15c   :  { %v1718_v33 = vpop.eup %1717  ;;  %1737 = vrcp.f32 %v851_v53  ;;  %v852_v59 = vadd.f32 1.0, %v1716_v21  ;;  %2659 = vst [vmem:[#allocation14_spill] sm:$0xff] %v2363_v8  ;;  %v2373_v10 = vpop.f32.mrb[26].mxu1  ;;  %v1417_v21 = vmul.f32 -1.442695, %v2354_v6  ;;  %v1008_v26 = vmul.f32 %v2319_v20, %v2217_v30 }
 0x15d   :  { %v1720_v51 = vpop.eup %1719  ;;  %1739 = vrcp.f32 %v820_v52  ;;  %v821_v62 = vadd.f32 1.0, %v1718_v33  ;;  %2660 = vst [vmem:[#allocation15_spill] sm:$0xff] %v2373_v10  ;;  %v2375_v38 = vpop.f32.mrb[27].mxu0  ;;  %v2390_v52 = vadd.f32 %v2284_v56, %v2166_v45  ;;  %v2396_v29 = vadd.f32 %v2288_v54, %v2168_v50 }
 0x15e   :  { %2661 = vst [vmem:[#allocation16_spill] sm:$0xff] %v2375_v38  ;;  %v1722_v9 = vpop.eup %1721  ;;  %1741 = vrcp.f32 %v852_v59  ;;  %v853_v7 = vadd.f32 1.0, %v1720_v51  ;;  %v2385_v15 = vpop.f32.mrb[27].mxu1  ;;  %v1450_v30 = vmul.f32 -1.442695, %v2379_v40 }
 0x15f   :  { %2662 = vst [vmem:[#allocation17_spill] sm:$0xff] %v2385_v15  ;;  %v1724_v53 = vpop.eup %1723  ;;  %1743 = vrcp.f32 %v821_v62  ;;  %v822_v19 = vadd.f32 1.0, %v1722_v9  ;;  %v1449_v9 = vmul.f32 -1.442695, %v2367_v5  ;;  %v1418_v15 = vmul.f32 -1.442695, %v2371_v37 }
 0x160   :  { %v1726_v33 = vpop.eup %1725  ;;  %1745 = vrcp.f32 %v853_v7  ;;  %v854_v59 = vadd.f32 1.0, %v1724_v53  ;;  %v1419_v20 = vmul.f32 -1.442695, %v2383_v27  ;;  %v2404_v7 = vpop.f32.mrb[28].mxu0 }
 0x161   :  { %v1728_v51 = vpop.eup %1727  ;;  %v1040_v62 = vmul.f32 %v1726_v33, %v2225_v18  ;;  %1747 = vrcp.f32 %v822_v19  ;;  %2663 = vst [vmem:[#allocation18_spill] sm:$0xff] %v2404_v7  ;;  %v2406_v54 = vpop.f32.mrb[28].mxu1  ;;  %v1451_v19 = vmul.f32 -1.442695, %v2390_v52  ;;  %v2412_v33 = vadd.f32 %v2290_v61, %v2168_v50 }
 0x162   :  { %v1730_v56 = vpop.eup %1729  ;;  %v1009_v38 = vmul.f32 %v1728_v51, %v2228_v28  ;;  %1749 = vrcp.f32 %v854_v59  ;;  %2664 = vst [vmem:[#allocation19_spill] sm:$0xff] %v2406_v54  ;;  %v2414_v28 = vpop.f32.mrb[29].mxu0  ;;  %v1420_v54 = vmul.f32 -1.442695, %v2396_v29 }
 0x163   :  { %v1732_v53 = vpop.eup %1731  ;;  %v1041_v18 = vmul.f32 %v1730_v56, %v2231_v34  ;;  %1751 = vpow2.f32 %v1416_v57  ;;  %2665 = vst [vmem:[#allocation20_spill] sm:$0xff] %v2414_v28  ;;  %v2416_v59 = vpop.f32.mrb[29].mxu1  ;;  %v2427_v28 = vadd.f32 %v2296_v47, %v2166_v45 }
 0x164   :  { %2666 = vst [vmem:[#allocation21_spill] sm:$0xff] %v2416_v59  ;;  %v1734_v51 = vpop.eup %1733  ;;  %v1502_v10 = vpack.c.bf16 %v1009_v38, %v1008_v26  ;;  %v1010_v7 = vmul.f32 %v1732_v53, %v2235_v42  ;;  %1753 = vpow2.f32 %v1448_v35  ;;  %v2420_v8 = vpop.f32.mrb[30].mxu0  ;;  %v2443_v53 = vadd.f32 %v2305_v31, %v2168_v50 }
 0x165   :  { %v2422_v34 = vpop.f32.mrb[30].mxu1  ;;  %v1736_v57 = vpop.eup %1735  ;;  %v1518_v56 = vpack.c.bf16 %v1041_v18, %v1040_v62  ;;  %v1042_v61 = vmul.f32 %v1734_v51, %v2240_v63  ;;  %1755 = vpow2.f32 %v1417_v21  ;;  %v2437_v62 = vadd.f32 %v2298_v55, %v2166_v45 }
 0x166   :  { %v2429_v59 = vpop.f32.mrb[31].mxu0  ;;  %v2431_v38 = vpop.f32.mrb[31].mxu1  ;;  %v1261_v35 = vadd.bf16 %v1502_v10, %v2117_v39  ;;  %v1011_v26 = vmul.f32 %v1736_v57, %v2243_v32  ;;  %1757 = vpow2.f32 %v1449_v9  ;;  %v1452_v10 = vmul.f32 -1.442695, %v2412_v33 }
 0x167   :  { %v1738_v42 = vpop.eup %1737  ;;  %v1277_v21 = vadd.bf16 %v1518_v56, %v2121_v41  ;;  %1759 = vpow2.f32 %v1418_v15 }
 0x168   :  { %v1740_v63 = vpop.eup %1739  ;;  %v1043_v47 = vmul.f32 %v1738_v42, %v2251_v12  ;;  %1293 = vst [vmem:[#allocation5 + $0x18] sm:$0xff] %v1261_v35  ;;  %v1503_v39 = vpack.c.bf16 %v1011_v26, %v1010_v7  ;;  %1761 = vpow2.f32 %v1450_v30  ;;  %v1421_v12 = vmul.f32 -1.442695, %v2427_v28  ;;  %v2667_v30 = vld [vmem:[#allocation9_spill] sm:$0xff] }
 0x169   :  { %v1742_v18 = vpop.eup %1741  ;;  %v1012_v32 = vmul.f32 %v1740_v63, %v2259_v23  ;;  %1309 = vst [vmem:[#allocation5 + $0x98] sm:$0xff] %v1277_v21  ;;  %1763 = vpow2.f32 %v1419_v20  ;;  %v1453_v7 = vmul.f32 -1.442695, %v2437_v62  ;;  %v2669_v21 = vld [vmem:[#allocation10_spill] sm:$0xff] }
 0x16a   :  { %v1744_v55 = vpop.eup %1743  ;;  %v1519_v9 = vpack.c.bf16 %v1043_v47, %v1042_v61  ;;  %v1044_v41 = vmul.f32 %v1742_v18, %v2266_v36  ;;  %v1262_v31 = vadd.bf16 %v1503_v39, %v2131_v46  ;;  %1765 = vpow2.f32 %v1451_v19  ;;  %v2668_v19 = vld [vmem:[#allocation8_spill] sm:$0xff] }
 0x16b   :  { %v1746_v15 = vpop.eup %1745  ;;  %v1013_v51 = vmul.f32 %v1744_v55, %v2274_v43  ;;  %1767 = vpow2.f32 %v1420_v54  ;;  %v1422_v61 = vmul.f32 -1.442695, %v2443_v53 }
 0x16c   :  { %v1748_v23 = vpop.eup %1747  ;;  %v1278_v57 = vadd.bf16 %v1519_v9, %v2667_v30  ;;  %v1045_v56 = vmul.f32 %v1746_v15, %v2280_v58  ;;  %1294 = vst [vmem:[#allocation5 + $0x20] sm:$0xff] %v1262_v31  ;;  %1769 = vpow2.f32 %v1452_v10  ;;  %v2459_v10 = vadd.f32 %v2307_v3, %v2168_v50 }
 0x16d   :  { %v1750_v36 = vpop.eup %1749  ;;  %v1504_v20 = vpack.c.bf16 %v1013_v51, %v1012_v32  ;;  %1771 = vpow2.f32 %v1421_v12  ;;  %v2467_v31 = vadd.f32 %v2325_v48, %v2166_v45  ;;  %v2471_v3 = vadd.f32 %v2327_v14, %v2168_v50 }
 0x16e   :  { %v1752_v42 = vpop.eup %1751  ;;  %1310 = vst [vmem:[#allocation5 + $0xa0] sm:$0xff] %v1278_v57  ;;  %v1520_v46 = vpack.c.bf16 %v1045_v56, %v1044_v41  ;;  %1773 = vpow2.f32 %v1453_v7  ;;  %v2463_v41 = vadd.f32 %v2323_v11, %v2166_v45  ;;  %v1454_v11 = vmul.f32 -1.442695, %v2459_v10 }
 0x16f   :  { %v1754_v43 = vpop.eup %1753  ;;  %v1263_v35 = vadd.bf16 %v1504_v20, %v2668_v19  ;;  %v823_v26 = vadd.f32 1.0, %v1752_v42  ;;  %1775 = vpow2.f32 %v1422_v61  ;;  %v2477_v48 = vadd.f32 %v2329_v24, %v2168_v50 }
 0x170   :  { %v1756_v63 = vpop.eup %1755  ;;  %v1279_v47 = vadd.bf16 %v1520_v46, %v2669_v21  ;;  %v855_v58 = vadd.f32 1.0, %v1754_v43  ;;  %v1423_v20 = vmul.f32 -1.442695, %v2463_v41  ;;  %v1455_v14 = vmul.f32 -1.442695, %v2467_v31 }
 0x171   :  { %v1758_v54 = vpop.eup %1757  ;;  %1295 = vst [vmem:[#allocation5 + $0x28] sm:$0xff] %v1263_v35  ;;  %1777 = vrcp.f32 %v823_v26  ;;  %v824_v18 = vadd.f32 1.0, %v1756_v63  ;;  %v2482_v43 = vadd.f32 %v2331_v17, %v2166_v45  ;;  %v1424_v26 = vmul.f32 -1.442695, %v2471_v3 }
 0x172   :  { %v1760_v39 = vpop.eup %1759  ;;  %1311 = vst [vmem:[#allocation5 + $0xa8] sm:$0xff] %v1279_v47  ;;  %1779 = vrcp.f32 %v855_v58  ;;  %v856_v32 = vadd.f32 1.0, %v1758_v54  ;;  %v2487_v63 = vadd.f32 %v2333_v25, %v2166_v45  ;;  %v1014_v21 = vmul.f32 %v1748_v23, %v2294_v49 }
 0x173   :  { %v1762_v55 = vpop.eup %1761  ;;  %1781 = vrcp.f32 %v824_v18  ;;  %v825_v9 = vadd.f32 1.0, %v1760_v39  ;;  %v2492_v58 = vadd.f32 %v2336_v60, %v2168_v50  ;;  %v1046_v54 = vmul.f32 %v1750_v36, %v2303_v44 }
 0x174   :  { %v1764_v12 = vpop.eup %1763  ;;  %1783 = vrcp.f32 %v856_v32  ;;  %v857_v15 = vadd.f32 1.0, %v1762_v55  ;;  %v1456_v39 = vmul.f32 -1.442695, %v2477_v48  ;;  %v1425_v55 = vmul.f32 -1.442695, %v2482_v43 }
 0x175   :  { %v1766_v51 = vpop.eup %1765  ;;  %1785 = vrcp.f32 %v825_v9  ;;  %v826_v7 = vadd.f32 1.0, %v1764_v12  ;;  %v2500_v49 = vadd.f32 %v2338_v13, %v2168_v50  ;;  %v1457_v44 = vmul.f32 -1.442695, %v2487_v63 }
 0x176   :  { %v1768_v30 = vpop.eup %1767  ;;  %1787 = vrcp.f32 %v857_v15  ;;  %v858_v57 = vadd.f32 1.0, %v1766_v51  ;;  %v2506_v36 = vadd.f32 %v2349_v2, %v2166_v45  ;;  %v1426_v15 = vmul.f32 -1.442695, %v2492_v58 }
 0x177   :  { %v1770_v56 = vpop.eup %1769  ;;  %1789 = vrcp.f32 %v826_v7  ;;  %v827_v61 = vadd.f32 1.0, %v1768_v30 }
 0x178   :  { %v1772_v42 = vpop.eup %1771  ;;  %1791 = vrcp.f32 %v858_v57  ;;  %v859_v46 = vadd.f32 1.0, %v1770_v56  ;;  %v2670_v57 = vld [vmem:[#allocation11_spill] sm:$0xff] }
 0x179   :  { %v1774_v19 = vpop.eup %1773  ;;  %1793 = vrcp.f32 %v827_v61  ;;  %v828_v35 = vadd.f32 1.0, %v1772_v42  ;;  %v2671_v61 = vld [vmem:[#allocation13_spill] sm:$0xff] }
 0x17a   :  { %v1776_v24 = vpop.eup %1775  ;;  %1795 = vrcp.f32 %v859_v46  ;;  %v860_v47 = vadd.f32 1.0, %v1774_v19 }
 0x17b   :  { %v1778_v17 = vpop.eup %1777  ;;  %1797 = vrcp.f32 %v828_v35  ;;  %v829_v18 = vadd.f32 1.0, %v1776_v24  ;;  %v2672_v24 = vld [vmem:[#allocation12_spill] sm:$0xff] }
 0x17c   :  { %v1780_v32 = vpop.eup %1779  ;;  %v1015_v25 = vmul.f32 %v1778_v17, %v2343_v16  ;;  %1799 = vrcp.f32 %v860_v47 }
 0x17d   :  { %v1782_v23 = vpop.eup %1781  ;;  %v1047_v60 = vmul.f32 %v1780_v32, %v2347_v0  ;;  %1801 = vrcp.f32 %v829_v18  ;;  %v2513_v0 = vadd.f32 %v2356_v22, %v2166_v45 }
 0x17e   :  { %v1784_v9 = vpop.eup %1783  ;;  %v1505_v12 = vpack.c.bf16 %v1015_v25, %v1014_v21  ;;  %v1016_v16 = vmul.f32 %v1782_v23, %v2354_v6  ;;  %1803 = vpow2.f32 %v1454_v11  ;;  %v1458_v6 = vmul.f32 -1.442695, %v2500_v49 }
 0x17f   :  { %v1786_v51 = vpop.eup %1785  ;;  %v1521_v13 = vpack.c.bf16 %v1047_v60, %v1046_v54  ;;  %v1048_v7 = vmul.f32 %v1784_v9, %v2367_v5  ;;  %1805 = vpow2.f32 %v1423_v20  ;;  %v2522_v5 = vadd.f32 %v2358_v4, %v2168_v50  ;;  %v1903_v54 = vld [vmem:[#allocation2 + $0xb8] sm:$0xff] }
 0x180   :  { %v1788_v30 = vpop.eup %1787  ;;  %v1264_v2 = vadd.bf16 %v1505_v12, %v2670_v57  ;;  %v1017_v56 = vmul.f32 %v1786_v51, %v2371_v37  ;;  %1807 = vpow2.f32 %v1455_v14  ;;  %v2527_v37 = vadd.f32 %v2361_v1, %v2168_v50 }
 0x181   :  { %v1790_v11 = vpop.eup %1789  ;;  %v1280_v42 = vadd.bf16 %v1521_v13, %v2671_v61  ;;  %v1049_v46 = vmul.f32 %v1788_v30, %v2379_v40  ;;  %1809 = vpow2.f32 %v1424_v26  ;;  %v1427_v26 = vmul.f32 -1.442695, %v2506_v36 }
 0x182   :  { %v1792_v22 = vpop.eup %1791  ;;  %1296 = vst [vmem:[#allocation5 + $0x30] sm:$0xff] %v1264_v2  ;;  %v1506_v20 = vpack.c.bf16 %v1017_v56, %v1016_v16  ;;  %v1018_v19 = vmul.f32 %v1790_v11, %v2383_v27  ;;  %1811 = vpow2.f32 %v1456_v39  ;;  %v1459_v27 = vmul.f32 -1.442695, %v2513_v0  ;;  %v1905_v16 = vld [vmem:[#allocation2 + $0xc0] sm:$0xff]  ;;  %v1906_v56 = vld [vmem:[#allocation2 + $0x48] sm:$0xff] }
 0x183   :  { %v1794_v14 = vpop.eup %1793  ;;  %1312 = vst [vmem:[#allocation5 + $0xb0] sm:$0xff] %v1280_v42  ;;  %v1522_v35 = vpack.c.bf16 %v1049_v46, %v1048_v7  ;;  %v1050_v40 = vmul.f32 %v1792_v22, %v2390_v52  ;;  %1813 = vpow2.f32 %v1425_v55  ;;  %v1428_v39 = vmul.f32 -1.442695, %v2522_v5  ;;  %v2673_v42 = vld [vmem:[#allocation14_spill] sm:$0xff] }
 0x184   :  { %v1796_v4 = vpop.eup %1795  ;;  %v1265_v21 = vadd.bf16 %v1506_v20, %v2672_v24  ;;  %v1019_v47 = vmul.f32 %v1794_v14, %v2396_v29  ;;  %1815 = vpow2.f32 %v1457_v44  ;;  %v1460_v29 = vmul.f32 -1.442695, %v2527_v37  ;;  %v1904_v44 = vld [vmem:[#allocation2 + $0x40] sm:$0xff] }
 0x185   :  { %v1798_v17 = vpop.eup %1797  ;;  %v1281_v1 = vadd.bf16 %v1903_v54, %v1522_v35  ;;  %v1051_v18 = vmul.f32 %v1796_v4, %v2412_v33  ;;  %1817 = vpow2.f32 %v1426_v15  ;;  %v2543_v46 = vadd.f32 %v2673_v42, %v2166_v45 }
 0x186   :  { %v2536_v52 = vpop.eup %1799  ;;  %1297 = vst [vmem:[#allocation5 + $0x38] sm:$0xff] %v1265_v21  ;;  %v1507_v32 = vpack.c.bf16 %v1019_v47, %v1018_v19  ;;  %v1020_v25 = vmul.f32 %v1798_v17, %v2427_v28  ;;  %1819 = vpow2.f32 %v1458_v6 }
 0x187   :  { %v1802_v55 = vpop.eup %1801  ;;  %1313 = vst [vmem:[#allocation5 + $0xb8] sm:$0xff] %v1281_v1  ;;  %v1523_v23 = vpack.c.bf16 %v1051_v18, %v1050_v40  ;;  %1821 = vpow2.f32 %v1427_v26  ;;  %v2674_v26 = vld [vmem:[#allocation15_spill] sm:$0xff]  ;;  %v1429_v47 = vmul.f32 -1.442695, %v2543_v46  ;;  %v2676_v18 = vld [vmem:[#allocation17_spill] sm:$0xff] }
 0x188   :  { %v1804_v60 = vpop.eup %1803  ;;  %v1266_v9 = vadd.bf16 %v1904_v44, %v1507_v32  ;;  %v1021_v33 = vmul.f32 %v1802_v55, %v2443_v53  ;;  %1823 = vpow2.f32 %v1459_v27  ;;  %v2547_v4 = vadd.f32 %v2674_v26, %v2166_v45  ;;  %v2675_v27 = vld [vmem:[#allocation16_spill] sm:$0xff]  ;;  %v2677_v32 = vld [vmem:[#allocation18_spill] sm:$0xff] }
 0x189   :  { %v1806_v12 = vpop.eup %1805  ;;  %v1282_v15 = vadd.bf16 %v1905_v16, %v1523_v23  ;;  %v861_v51 = vadd.f32 1.0, %v1804_v60  ;;  %1825 = vpow2.f32 %v1428_v39  ;;  %v2552_v17 = vadd.f32 %v2675_v27, %v2168_v50  ;;  %v2678_v23 = vld [vmem:[#allocation19_spill] sm:$0xff]  ;;  %v2679_v44 = vld [vmem:[#allocation20_spill] sm:$0xff] }
 0x18a   :  { %v1808_v13 = vpop.eup %1807  ;;  %1298 = vst [vmem:[#allocation5 + $0x40] sm:$0xff] %v1266_v9  ;;  %v1508_v28 = vpack.c.bf16 %v1021_v33, %v1020_v25  ;;  %v830_v7 = vadd.f32 1.0, %v1806_v12  ;;  %1827 = vpow2.f32 %v1460_v29  ;;  %v2556_v39 = vadd.f32 %v2676_v18, %v2168_v50 }
 0x18b   :  { %v1810_v30 = vpop.eup %1809  ;;  %1314 = vst [vmem:[#allocation5 + $0xc0] sm:$0xff] %v1282_v15  ;;  %1829 = vrcp.f32 %v861_v51  ;;  %v862_v57 = vadd.f32 1.0, %v1808_v13  ;;  %v2560_v25 = vadd.f32 %v2677_v32, %v2166_v45  ;;  %v2564_v60 = vadd.f32 %v2678_v23, %v2166_v45 }
 0x18c   :  { %v1812_v2 = vpop.eup %1811  ;;  %v1267_v6 = vadd.bf16 %v1906_v56, %v1508_v28  ;;  %1831 = vrcp.f32 %v830_v7  ;;  %v831_v53 = vadd.f32 1.0, %v1810_v30  ;;  %v2568_v9 = vadd.f32 %v2679_v44, %v2168_v50  ;;  %v2680_v7 = vld [vmem:[#allocation21_spill] sm:$0xff] }
 0x18d   :  { %v1814_v11 = vpop.eup %1813  ;;  %1833 = vrcp.f32 %v862_v57  ;;  %v863_v61 = vadd.f32 1.0, %v1812_v2  ;;  %v1052_v12 = vmul.f32 %v2536_v52, %v2437_v62  ;;  %v1461_v15 = vmul.f32 -1.442695, %v2547_v4 }
 0x18e   :  { %v1816_v22 = vpop.eup %1815  ;;  %1299 = vst [vmem:[#allocation5 + $0x48] sm:$0xff] %v1267_v6  ;;  %1835 = vrcp.f32 %v831_v53  ;;  %v832_v20 = vadd.f32 1.0, %v1814_v11  ;;  %v1430_v28 = vmul.f32 -1.442695, %v2552_v17  ;;  %v2576_v30 = vadd.f32 %v2680_v7, %v2168_v50  ;;  %v1911_v7 = vld [vmem:[#allocation2 + $0xd8] sm:$0xff] }
 0x18f   :  { %v1818_v19 = vpop.eup %1817  ;;  %1837 = vrcp.f32 %v863_v61  ;;  %v864_v14 = vadd.f32 1.0, %v1816_v22  ;;  %v1462_v56 = vmul.f32 -1.442695, %v2556_v39  ;;  %v1431_v62 = vmul.f32 -1.442695, %v2560_v25 }
 0x190   :  { %v1820_v35 = vpop.eup %1819  ;;  %1839 = vrcp.f32 %v832_v20  ;;  %v833_v40 = vadd.f32 1.0, %v1818_v19  ;;  %v1463_v53 = vmul.f32 -1.442695, %v2564_v60  ;;  %v1432_v11 = vmul.f32 -1.442695, %v2568_v9 }
 0x191   :  { %v1822_v24 = vpop.eup %1821  ;;  %1841 = vrcp.f32 %v864_v14  ;;  %v865_v21 = vadd.f32 1.0, %v1820_v35  ;;  %v2593_v14 = vadd.f32 %v2422_v34, %v2166_v45 }
 0x192   :  { %v1824_v54 = vpop.eup %1823  ;;  %1843 = vrcp.f32 %v833_v40  ;;  %v834_v1 = vadd.f32 1.0, %v1822_v24  ;;  %v1907_v40 = vld [vmem:[#allocation2 + $0xc8] sm:$0xff] }
 0x193   :  { %v1826_v29 = vpop.eup %1825  ;;  %1845 = vrcp.f32 %v865_v21  ;;  %v866_v55 = vadd.f32 1.0, %v1824_v54 }
 0x194   :  { %v1828_v33 = vpop.eup %1827  ;;  %1847 = vrcp.f32 %v834_v1  ;;  %v835_v16 = vadd.f32 1.0, %v1826_v29  ;;  %v1909_v29 = vld [vmem:[#allocation2 + $0xd0] sm:$0xff] }
 0x195   :  { %v1830_v51 = vpop.eup %1829  ;;  %1849 = vrcp.f32 %v866_v55  ;;  %v867_v13 = vadd.f32 1.0, %v1828_v33 }
 0x196   :  { %v1832_v57 = vpop.eup %1831  ;;  %v1053_v2 = vmul.f32 %v1830_v51, %v2459_v10  ;;  %1851 = vrcp.f32 %v835_v16  ;;  %v2587_v10 = vadd.f32 %v2420_v8, %v2166_v45  ;;  %v2598_v8 = vadd.f32 %v2429_v59, %v2168_v50  ;;  %v1908_v59 = vld [vmem:[#allocation2 + $0x50] sm:$0xff]  ;;  %v1910_v51 = vld [vmem:[#allocation2 + $0x58] sm:$0xff] }
 0x197   :  { %v1834_v52 = vpop.eup %1833  ;;  %v1022_v6 = vmul.f32 %v1832_v57, %v2463_v41  ;;  %1853 = vrcp.f32 %v867_v13  ;;  %v1464_v41 = vmul.f32 -1.442695, %v2576_v30 }
 0x198   :  { %v1836_v61 = vpop.eup %1835  ;;  %v1524_v42 = vpack.c.bf16 %v1053_v2, %v1052_v12  ;;  %v1054_v22 = vmul.f32 %v1834_v52, %v2467_v31  ;;  %1855 = vpow2.f32 %v1429_v47  ;;  %v2603_v47 = vadd.f32 %v2431_v38, %v2168_v50 }
 0x199   :  { %v1838_v20 = vpop.eup %1837  ;;  %v1023_v19 = vmul.f32 %v1836_v61, %v2471_v3  ;;  %1857 = vpow2.f32 %v1461_v15  ;;  %v1434_v55 = vmul.f32 -1.442695, %v2598_v8 }
 0x19a   :  { %v1840_v35 = vpop.eup %1839  ;;  %v1283_v26 = vadd.bf16 %v1907_v40, %v1524_v42  ;;  %v1055_v31 = vmul.f32 %v1838_v20, %v2477_v48  ;;  %1859 = vpow2.f32 %v1430_v28  ;;  %v1433_v48 = vmul.f32 -1.442695, %v2587_v10 }
 0x19b   :  { %v1842_v24 = vpop.eup %1841  ;;  %v1509_v21 = vpack.c.bf16 %v1023_v19, %v1022_v6  ;;  %v1024_v3 = vmul.f32 %v1840_v35, %v2482_v43  ;;  %1861 = vpow2.f32 %v1462_v56  ;;  %v1465_v43 = vmul.f32 -1.442695, %v2593_v14 }
 0x19c   :  { %v1844_v45 = vpop.eup %1843  ;;  %1315 = vst [vmem:[#allocation5 + $0xc8] sm:$0xff] %v1283_v26  ;;  %v1525_v34 = vpack.c.bf16 %v1055_v31, %v1054_v22  ;;  %v1056_v27 = vmul.f32 %v1842_v24, %v2487_v63  ;;  %1863 = vpow2.f32 %v1431_v62  ;;  %v1466_v33 = vmul.f32 -1.442695, %v2603_v47  ;;  %v1913_v22 = vld [vmem:[#allocation2 + $0xe0] sm:$0xff] }
 0x19d   :  { %v1846_v54 = vpop.eup %1845  ;;  %v1268_v1 = vadd.bf16 %v1908_v59, %v1509_v21  ;;  %v1025_v18 = vmul.f32 %v1844_v45, %v2492_v58  ;;  %1865 = vpow2.f32 %v1463_v53 }
 0x19e   :  { %v1848_v32 = vpop.eup %1847  ;;  %v1284_v50 = vadd.bf16 %v1909_v29, %v1525_v34  ;;  %v1057_v38 = vmul.f32 %v1846_v54, %v2500_v49  ;;  %1867 = vpow2.f32 %v1432_v11  ;;  %v1912_v11 = vld [vmem:[#allocation2 + $0x60] sm:$0xff] }
 0x19f   :  { %v1850_v63 = vpop.eup %1849  ;;  %1300 = vst [vmem:[#allocation5 + $0x50] sm:$0xff] %v1268_v1  ;;  %v1510_v23 = vpack.c.bf16 %v1025_v18, %v1024_v3  ;;  %v1026_v44 = vmul.f32 %v1848_v32, %v2506_v36  ;;  %1869 = vpow2.f32 %v1464_v41 }
 0x1a0   :  { %v1852_v58 = vpop.eup %1851  ;;  %1316 = vst [vmem:[#allocation5 + $0xd0] sm:$0xff] %v1284_v50  ;;  %v1526_v12 = vpack.c.bf16 %v1057_v38, %v1056_v27  ;;  %v1058_v16 = vmul.f32 %v1850_v63, %v2513_v0  ;;  %1871 = vpow2.f32 %v1433_v48 }
 0x1a1   :  { %v1854_v15 = vpop.eup %1853  ;;  %v1269_v49 = vadd.bf16 %v1910_v51, %v1510_v23  ;;  %v1027_v13 = vmul.f32 %v1852_v58, %v2522_v5  ;;  %1873 = vpow2.f32 %v1465_v43 }
 0x1a2   :  { %v1856_v28 = vpop.eup %1855  ;;  %v1285_v57 = vadd.bf16 %v1911_v7, %v1526_v12  ;;  %v1059_v36 = vmul.f32 %v1854_v15, %v2527_v37  ;;  %1875 = vpow2.f32 %v1434_v55 }
 0x1a3   :  { %v1858_v2 = vpop.eup %1857  ;;  %1301 = vst [vmem:[#allocation5 + $0x58] sm:$0xff] %v1269_v49  ;;  %v1511_v56 = vpack.c.bf16 %v1027_v13, %v1026_v44  ;;  %v836_v62 = vadd.f32 1.0, %v1856_v28  ;;  %1877 = vpow2.f32 %v1466_v33  ;;  %v1915_v13 = vld [vmem:[#allocation2 + $0xe8] sm:$0xff] }
 0x1a4   :  { %v1860_v52 = vpop.eup %1859  ;;  %1317 = vst [vmem:[#allocation5 + $0xd8] sm:$0xff] %v1285_v57  ;;  %v1527_v0 = vpack.c.bf16 %v1059_v36, %v1058_v16  ;;  %v868_v6 = vadd.f32 1.0, %v1858_v2 }
 0x1a5   :  { %v1862_v53 = vpop.eup %1861  ;;  %v1270_v61 = vadd.bf16 %v1912_v11, %v1511_v56  ;;  %1879 = vrcp.f32 %v836_v62  ;;  %v837_v5 = vadd.f32 1.0, %v1860_v52  ;;  %v1916_v56 = vld [vmem:[#allocation2 + $0x70] sm:$0xff] }
 0x1a6   :  { %v1864_v42 = vpop.eup %1863  ;;  %v1286_v20 = vadd.bf16 %v1913_v22, %v1527_v0  ;;  %1881 = vrcp.f32 %v868_v6  ;;  %v869_v37 = vadd.f32 1.0, %v1862_v53  ;;  %v1917_v52 = vld [vmem:[#allocation2 + $0xf0] sm:$0xff]  ;;  %v1918_v53 = vld [vmem:[#allocation2 + $0x78] sm:$0xff] }
 0x1a7   :  { %v1866_v19 = vpop.eup %1865  ;;  %1302 = vst [vmem:[#allocation5 + $0x60] sm:$0xff] %v1270_v61  ;;  %1883 = vrcp.f32 %v837_v5  ;;  %v838_v41 = vadd.f32 1.0, %v1864_v42  ;;  %v1919_v61 = vld [vmem:[#allocation2 + $0xf8] sm:$0xff] }
 0x1a8   :  { %v1868_v35 = vpop.eup %1867  ;;  %1318 = vst [vmem:[#allocation5 + $0xe0] sm:$0xff] %v1286_v20  ;;  %1885 = vrcp.f32 %v869_v37  ;;  %v870_v40 = vadd.f32 1.0, %v1866_v19 }
 0x1a9   :  { %v1870_v26 = vpop.eup %1869  ;;  %1887 = vrcp.f32 %v838_v41  ;;  %v839_v31 = vadd.f32 1.0, %v1868_v35 }
 0x1aa   :  { %v1872_v24 = vpop.eup %1871  ;;  %1889 = vrcp.f32 %v870_v40  ;;  %v871_v21 = vadd.f32 1.0, %v1870_v26 }
 0x1ab   :  { %v1874_v3 = vpop.eup %1873  ;;  %1891 = vrcp.f32 %v839_v31  ;;  %v840_v45 = vadd.f32 1.0, %v1872_v24 }
 0x1ac   :  { %v1876_v34 = vpop.eup %1875  ;;  %1893 = vrcp.f32 %v871_v21  ;;  %v872_v27 = vadd.f32 1.0, %v1874_v3 }
 0x1ad   :  { %v1878_v48 = vpop.eup %1877  ;;  %1895 = vrcp.f32 %v840_v45  ;;  %v841_v54 = vadd.f32 1.0, %v1876_v34 }
 0x1ae   :  { %1897 = vrcp.f32 %v872_v27  ;;  %v873_v59 = vadd.f32 1.0, %v1878_v48 }
 0x1af   :  { %v1880_v1 = vpop.eup %1879  ;;  %1899 = vrcp.f32 %v841_v54 }
 0x1b0   :  { %v1882_v18 = vpop.eup %1881  ;;  %v1028_v43 = vmul.f32 %v1880_v1, %v2543_v46  ;;  %1901 = vrcp.f32 %v873_v59  ;;  %v1914_v46 = vld [vmem:[#allocation2 + $0x68] sm:$0xff] }
 0x1b1   :  { %v1884_v32 = vpop.eup %1883  ;;  %v1060_v29 = vmul.f32 %v1882_v18, %v2547_v4 }
 0x1b2   :  { %v1886_v50 = vpop.eup %1885  ;;  %v1029_v38 = vmul.f32 %v1884_v32, %v2552_v17 }
 0x1b3   :  { %v1888_v55 = vpop.eup %1887  ;;  %v1061_v63 = vmul.f32 %v1886_v50, %v2556_v39 }
 0x1b4   :  { %v1890_v23 = vpop.eup %1889  ;;  %v1512_v44 = vpack.c.bf16 %v1029_v38, %v1028_v43  ;;  %v1030_v33 = vmul.f32 %v1888_v55, %v2560_v25 }
 0x1b5   :  { %v1892_v58 = vpop.eup %1891  ;;  %v1528_v12 = vpack.c.bf16 %v1061_v63, %v1060_v29  ;;  %v1062_v16 = vmul.f32 %v1890_v23, %v2564_v60 }
 0x1b6   :  { %v1894_v15 = vpop.eup %1893  ;;  %v1271_v51 = vadd.bf16 %v1914_v46, %v1512_v44  ;;  %v1031_v49 = vmul.f32 %v1892_v58, %v2568_v9 }
 0x1b7   :  { %v1896_v4 = vpop.eup %1895  ;;  %v1287_v28 = vadd.bf16 %v1915_v13, %v1528_v12  ;;  %v1063_v17 = vmul.f32 %v1894_v15, %v2576_v30 }
 0x1b8   :  { %v1898_v7 = vpop.eup %1897  ;;  %1303 = vst [vmem:[#allocation5 + $0x68] sm:$0xff] %v1271_v51  ;;  %v1513_v39 = vpack.c.bf16 %v1031_v49, %v1030_v33  ;;  %v1032_v57 = vmul.f32 %v1896_v4, %v2587_v10 }
 0x1b9   :  { %v1900_v25 = vpop.eup %1899  ;;  %1319 = vst [vmem:[#allocation5 + $0xe8] sm:$0xff] %v1287_v28  ;;  %v1529_v36 = vpack.c.bf16 %v1063_v17, %v1062_v16  ;;  %v1064_v60 = vmul.f32 %v1898_v7, %v2593_v14 }
 0x1ba   :  { %v1902_v2 = vpop.eup %1901  ;;  %v1272_v62 = vadd.bf16 %v1916_v56, %v1513_v39  ;;  %v1033_v9 = vmul.f32 %v1900_v25, %v2598_v8 }
 0x1bb   :  { %v1288_v0 = vadd.bf16 %v1917_v52, %v1529_v36  ;;  %v1065_v6 = vmul.f32 %v1902_v2, %v2603_v47 }
 0x1bc   :  { %1304 = vst [vmem:[#allocation5 + $0x70] sm:$0xff] %v1272_v62  ;;  %v1514_v30 = vpack.c.bf16 %v1033_v9, %v1032_v57 }
 0x1bd   :  { %1320 = vst [vmem:[#allocation5 + $0xf0] sm:$0xff] %v1288_v0  ;;  %v1530_v10 = vpack.c.bf16 %v1065_v6, %v1064_v60 }
 0x1be   :  { %v1273_v11 = vadd.bf16 %v1918_v53, %v1514_v30 }
 0x1bf   :  { %v1289_v5 = vadd.bf16 %v1919_v61, %v1530_v10 }
 0x1c0   :  { %1305 = vst [vmem:[#allocation5 + $0x78] sm:$0xff] %v1273_v11 }
 0x1c1   :  { %1321 = vst [vmem:[#allocation5 + $0xf8] sm:$0xff] %v1289_v5 }
 0x1c2   :  { %1953 = shalt.err (!%p1950_p12)
}
 0x1c3   :  { %s1954_s15 = scalar_lea.hbm %s2646_s3, 4096 }
 0x1c4   :  { %p1955_p13 = scmp.ne.s32.totalorder %s2646_s3, %s1954_s15  ;;  %p1958_p0 = scmp.lt.u32.totalorder %s1954_s15, %s2646_s3 }
 0x1c6   :  { %p1960_p1 = pnand %p1958_p0, %p1955_p13 }
 0x1c8   :  { %1963 = shalt.err (!%p1960_p1)
}
 0x1c9   :  { %1333 = dma.vmem_to_hbm [thread:$0]  %s1328_s11, 4096, %s2646_s3, [#allocation4], %s1969_s22, %s1969_s22, %s1970_s23  }
 0x1ca   :  { %1966 = dma.done.wait [#allocation4], 4096  }
 0x1cb   :  { %1967 = vsyncadd [#allocation4], 4294963200 }
 0x1cc   :  { %1337 = vsyncpa [#allocation3], 1 }
 0x1cd   :  { %1338 = vsyncpa [#allocation4], 1 }

</bundles_post_ra>
